<compile_context>
chip_gen: v7x
topology: tpu7x:2x2x1
jax: 0.10.0
libtpu: 0.0.40
codegen_flags: <defaults>
</compile_context>

<pallas_src>
import numpy as np
import jax
import jax.numpy as jnp
from jax import lax
from jax.experimental import pallas as pl
from jax.experimental.pallas import tpu as pltpu

NUM_QUBITS = 11
DIM = 1 << NUM_QUBITS          # 2048 basis states
SUB, LANE = 16, 128            # packed statevector layout, DIM = SUB * LANE
SUB_BITS = 4                   # bits of the basis index stored in the sublane axis

# wire -> bit position of the packed index (position 0 = MSB ... 10 = LSB).
# Positions 0..3 -> sublane bits, positions 4..10 -> lane bits.
# Positions 0 (sublane stride 8) and 4 (lane stride 64) are the cheap
# half-axis-flip slots; wires 1 and 2 (flipped most often) are mapped there.
WIRE_POS = {1: 0, 0: 1, 4: 2, 3: 3, 2: 4, 5: 5, 6: 6, 7: 7, 8: 8, 9: 9, 10: 10}

# Circuit program: ("H", wire) | ("ROT", param_idx, wire) | ("CZ", a, b)
#                  ("CNOT", ctrl, tgt) | ("TOFF", c1, c2, tgt)
CIRCUIT = [
    ("H", 0), ("H", 1), ("H", 2),
    ("ROT", 0, 0), ("ROT", 1, 1), ("ROT", 2, 2),
    ("CZ", 0, 1), ("CZ", 1, 2), ("CZ", 2, 0),
    ("TOFF", 0, 1, 3), ("TOFF", 0, 2, 4),
    ("ROT", 3, 3), ("ROT", 4, 4),
    ("CZ", 3, 4),
    ("CNOT", 3, 5), ("CNOT", 3, 7), ("CNOT", 4, 6), ("CNOT", 4, 8),
    ("ROT", 5, 5), ("ROT", 6, 7), ("ROT", 7, 6), ("ROT", 8, 8),
    ("CNOT", 5, 1), ("CNOT", 6, 2),
    ("TOFF", 0, 1, 9), ("TOFF", 0, 2, 10),
    ("ROT", 9, 9), ("ROT", 10, 10),
    ("CZ", 5, 7), ("CZ", 6, 8), ("CZ", 8, 9), ("CZ", 9, 10), ("CZ", 10, 6),
]


def _preprocess(circuit):
    """Trace-time rewrite: drop trailing diagonal CZs (|amp|^2 invariant) and
    fuse runs of consecutive CZs into a single parity-sign flip ("DIAG")."""
    ops = list(circuit)
    while ops and ops[-1][0] == "CZ":
        ops.pop()
    fused = []
    for op in ops:
        if op[0] == "CZ":
            if fused and fused[-1][0] == "DIAG":
                fused[-1] = ("DIAG", fused[-1][1] + [(op[1], op[2])])
            else:
                fused.append(("DIAG", [(op[1], op[2])]))
        else:
            fused.append(op)
    return fused


_PROGRAM = _preprocess(CIRCUIT)


def _make_kernel(emit_probs: bool):
    """Builds the kernel.  Signature:
         kernel(gvec_ref[SMEM (88,) f32], exp_ref[VMEM (16,128) f32],
                [probs_ref (16,128) f32,]  sample_ref (1,128) i32)"""

    def kernel(gvec_ref, exp_ref, *out_refs):
        if emit_probs:
            probs_ref, sample_ref = out_refs
        else:
            (sample_ref,) = out_refs

        r = lax.broadcasted_iota(jnp.int32, (SUB, LANE), 0)   # sublane index
        l = lax.broadcasted_iota(jnp.int32, (SUB, LANE), 1)   # lane index

        # Hoisted per-wire BOOLEAN bit masks (computed once, reused everywhere).
        bitb = []
        for w in range(NUM_QUBITS):
            p = WIRE_POS[w]
            if p < SUB_BITS:
                b = (r >> (SUB_BITS - 1 - p)) & 1
            else:
                b = (l >> (NUM_QUBITS - 1 - p)) & 1
            bitb.append(b == 1)

        def flip(x, w):
            """x[index XOR stride(wire w)] via sublane/lane rotations (XLU)."""
            p = WIRE_POS[w]
            if p < SUB_BITS:
                axis, n, s = 0, SUB, 1 << (SUB_BITS - 1 - p)
            else:
                axis, n, s = 1, LANE, 1 << (NUM_QUBITS - 1 - p)
            if 2 * s == n:                            # half-axis: exact XOR flip
                return pltpu.roll(x, s, axis=axis)    # single roll, no select
            plus = pltpu.roll(x, n - s, axis=axis)    # x[idx + s]
            minus = pltpu.roll(x, s, axis=axis)       # x[idx - s]
            return jnp.where(bitb[w], minus, plus)    # bit==0 -> plus, bit==1 -> minus

        re = jnp.where(jnp.logical_and(r == 0, l == 0),
                       jnp.float32(1.0), jnp.float32(0.0))
        im = jnp.zeros((SUB, LANE), jnp.float32)
        inv_sqrt2 = jnp.float32(0.7071067811865476)

        for op in _PROGRAM:
            kind = op[0]
            if kind == "H":
                w = op[1]
                fre, fim = flip(re, w), flip(im, w)
                re = inv_sqrt2 * jnp.where(bitb[w], fre - re, fre + re)
                im = inv_sqrt2 * jnp.where(bitb[w], fim - im, fim + im)
            elif kind == "ROT":
                g, w = op[1], op[2]
                base = 8 * g
                u00r = gvec_ref[base + 0]; u00i = gvec_ref[base + 1]
                u01r = gvec_ref[base + 2]; u01i = gvec_ref[base + 3]
                u10r = gvec_ref[base + 4]; u10i = gvec_ref[base + 5]
                u11r = gvec_ref[base + 6]; u11i = gvec_ref[base + 7]
                bw = bitb[w]
                a_r = jnp.where(bw, u11r, u00r)       # "own amplitude" coefficient
                a_i = jnp.where(bw, u11i, u00i)
                c_r = jnp.where(bw, u10r, u01r)       # "partner amplitude" coefficient
                c_i = jnp.where(bw, u10i, u01i)
                fre, fim = flip(re, w), flip(im, w)
                nre = a_r * re - a_i * im + c_r * fre - c_i * fim
                nim = a_r * im + a_i * re + c_r * fim + c_i * fre
                re, im = nre, nim
            elif kind == "DIAG":                      # fused run of CZ gates
                parity = None
                for (a, b) in op[1]:
                    cond = jnp.logical_and(bitb[a], bitb[b])
                    parity = cond if parity is None else jnp.logical_xor(parity, cond)
                re = jnp.where(parity, -re, re)
                im = jnp.where(parity, -im, im)
            elif kind == "CNOT":
                c, t = op[1], op[2]
                re = jnp.where(bitb[c], flip(re, t), re)
                im = jnp.where(bitb[c], flip(im, t), im)
            else:  # "TOFF"
                c1, c2, t = op[1], op[2], op[3]
                ctrl = jnp.logical_and(bitb[c1], bitb[c2])
                re = jnp.where(ctrl, flip(re, t), re)
                im = jnp.where(ctrl, flip(im, t), im)

        probs = re * re + im * im
        if emit_probs:
            probs_ref[...] = probs

        # ---- single shot (qml.sample, shots=1): exponential race + packed-key argmax
        e = jnp.maximum(exp_ref[...], jnp.float32(1e-30))    # Exp(1) variates
        score = probs / e                                    # argmax ~ Categorical(probs)
        flat = r * LANE + l                                  # recomputed in epilogue only
        key_bits = lax.bitcast_convert_type(score, jnp.int32)   # monotone for score >= 0
        key = (key_bits & jnp.int32(~(DIM - 1))) | flat
        best = jnp.max(jnp.max(key, axis=1, keepdims=True), axis=0, keepdims=True)
        idx = best & jnp.int32(DIM - 1)                      # (1,1) packed basis index

        # Undo the wire permutation: packed bit (10 - WIRE_POS[w]) -> std bit (10 - w).
        groups = {}
        for w in range(NUM_QUBITS):
            d = WIRE_POS[w] - w
            m = 1 << (NUM_QUBITS - 1 - WIRE_POS[w])
            groups[d] = groups.get(d, 0) | m
        std = None
        for d, m in sorted(groups.items()):
            part = idx & jnp.int32(m)
            part = (part << d) if d >= 0 else (part >> (-d))
            std = part if std is None else (std | part)

        # Vectorized bit decode: lane w holds bit of wire w (standard wire order).
        lane = lax.broadcasted_iota(jnp.int32, (1, LANE), 1)
        shift = jnp.maximum(jnp.int32(NUM_QUBITS - 1) - lane, 0)
        std_b = jnp.broadcast_to(std, (1, LANE))
        bits = lax.shift_right_logical(std_b, shift) & jnp.int32(1)
        sample_ref[...] = jnp.where(lane < NUM_QUBITS, bits, jnp.int32(0))

    return kernel


_VMEM = pltpu.MemorySpace.VMEM
_SMEM = pltpu.MemorySpace.SMEM


def _build_call(emit_probs: bool):
    sample_shape = jax.ShapeDtypeStruct((1, LANE), jnp.int32)
    if emit_probs:
        out_shape = (jax.ShapeDtypeStruct((SUB, LANE), jnp.float32), sample_shape)
        out_specs = (pl.BlockSpec(memory_space=_VMEM),
                     pl.BlockSpec(memory_space=_VMEM))
    else:
        out_shape = sample_shape
        out_specs = pl.BlockSpec(memory_space=_VMEM)
    return pl.pallas_call(
        _make_kernel(emit_probs),
        out_shape=out_shape,
        in_specs=[pl.BlockSpec(memory_space=_SMEM),     # (88,) gate coefficients
                  pl.BlockSpec(memory_space=_VMEM)],    # (16,128) Exp(1) shot noise
        out_specs=out_specs,
    )


_sample_only_call = _build_call(emit_probs=False)   # production: no probs writeback
_debug_call = _build_call(emit_probs=True)          # debug: probs + sample


def rot_matrices(weights):
    """(11,3) Rot params -> (11,8) packed complex 2x2 matrices (glue, outside kernel)."""
    phi, th, om = weights[:, 0], weights[:, 1], weights[:, 2]
    c = jnp.cos(th / 2)
    s = jnp.sin(th / 2)
    a = (phi + om) / 2
    b = (phi - om) / 2
    u00r, u00i = jnp.cos(a) * c, -jnp.sin(a) * c
    u01r, u01i = -jnp.cos(b) * s, -jnp.sin(b) * s
    u10r, u10i = jnp.cos(b) * s, -jnp.sin(b) * s
    u11r, u11i = jnp.cos(a) * c, jnp.sin(a) * c
    return jnp.stack([u00r, u00i, u01r, u01i, u10r, u10i, u11r, u11i],
                     axis=1).astype(jnp.float32)


@jax.jit
def quantum_torch_model_forward(weights, shot_key):
    """Equivalent of QuantumTorchModel.forward(): one shot over 11 wires -> (11,) bits."""
    gvec = rot_matrices(weights).reshape(-1)                           # (88,) -> SMEM
    e = jax.random.exponential(shot_key, (SUB, LANE), dtype=jnp.float32)
    sample_vec = _sample_only_call(gvec, e)
    return sample_vec[0, :NUM_QUBITS]


@jax.jit
def circuit_probs_and_sample(weights, shot_key):
    """Debug variant: (probs (16,128) in the kernel's permuted basis order, sample (11,))."""
    gvec = rot_matrices(weights).reshape(-1)
    e = jax.random.exponential(shot_key, (SUB, LANE), dtype=jnp.float32)
    probs2d, sample_vec = _debug_call(gvec, e)
    return probs2d, sample_vec[0, :NUM_QUBITS]


def _reference_probs(gmats_np):
    """Pure numpy statevector reference (PennyLane/standard index order)."""
    psi = np.zeros((2,) * NUM_QUBITS, dtype=np.complex128)
    psi[(0,) * NUM_QUBITS] = 1.0
    H = np.array([[1, 1], [1, -1]], dtype=np.complex128) / np.sqrt(2)
    CZ4 = np.diag([1., 1., 1., -1.]).astype(np.complex128)
    CNOT4 = np.array([[1, 0, 0, 0], [0, 1, 0, 0],
                      [0, 0, 0, 1], [0, 0, 1, 0]], dtype=np.complex128)
    TOFF8 = np.eye(8, dtype=np.complex128)
    TOFF8[6, 6] = TOFF8[7, 7] = 0.0
    TOFF8[6, 7] = TOFF8[7, 6] = 1.0

    def apply(psi, U, wires):
        m = len(wires)
        psi = np.moveaxis(psi, list(wires), list(range(m)))
        shp = psi.shape
        psi = (U @ psi.reshape(2 ** m, -1)).reshape(shp)
        return np.moveaxis(psi, list(range(m)), list(wires))

    for op in CIRCUIT:
        if op[0] == "H":
            psi = apply(psi, H, (op[1],))
        elif op[0] == "ROT":
            g = gmats_np[op[1]].astype(np.float64)
            U = np.array([[g[0] + 1j * g[1], g[2] + 1j * g[3]],
                          [g[4] + 1j * g[5], g[6] + 1j * g[7]]])
            psi = apply(psi, U, (op[2],))
        elif op[0] == "CZ":
            psi = apply(psi, CZ4, (op[1], op[2]))
        elif op[0] == "CNOT":
            psi = apply(psi, CNOT4, (op[1], op[2]))
        else:
            psi = apply(psi, TOFF8, (op[1], op[2], op[3]))
    return np.abs(psi.reshape(-1)) ** 2


def _std_to_kernel_index(i_std):
    """PennyLane flat index -> kernel's permuted packed index."""
    i_k = 0
    for w in range(NUM_QUBITS):
        q = (i_std >> (NUM_QUBITS - 1 - w)) & 1
        i_k |= q << (NUM_QUBITS - 1 - WIRE_POS[w])
    return i_k


if __name__ == "__main__":
    key = jax.random.PRNGKey(0)
    k_w, k_shot = jax.random.split(key)
    # nn.Parameter init: uniform(-2*pi, 2*pi), shape (11, 3)
    weights = jax.random.uniform(k_w, (NUM_QUBITS, 3), dtype=jnp.float32,
                                 minval=-2 * np.pi, maxval=2 * np.pi)

    sample = quantum_torch_model_forward(weights, k_shot)
    probs2d, sample_dbg = circuit_probs_and_sample(weights, k_shot)
    sample, probs2d, sample_dbg = jax.block_until_ready((sample, probs2d, sample_dbg))

    probs_flat = np.asarray(probs2d, dtype=np.float64).reshape(-1)
    sample_np = np.asarray(sample)

    # Correctness checks against a pure-numpy statevector reference.
    gmats_np = np.asarray(rot_matrices(weights), dtype=np.float64)
    ref_std = _reference_probs(gmats_np)
    ref_kernel = np.zeros(DIM, dtype=np.float64)
    for i_std in range(DIM):
        ref_kernel[_std_to_kernel_index(i_std)] = ref_std[i_std]

    assert np.isclose(probs_flat.sum(), 1.0, atol=1e-4), "norm not preserved"
    assert np.allclose(probs_flat, ref_kernel, atol=1e-4), "probs mismatch vs reference"
    assert sample_np.shape == (NUM_QUBITS,)
    assert np.all((sample_np == 0) | (sample_np == 1)), "sample bits not in {0,1}"
    assert np.array_equal(sample_np, np.asarray(sample_dbg)), "prod/debug sample mismatch"
    i_std = 0
    for w in range(NUM_QUBITS):
        i_std |= int(sample_np[w]) << (NUM_QUBITS - 1 - w)
    assert probs_flat[_std_to_kernel_index(i_std)] > 1e-20, \
        "sampled a (near-)zero probability basis state"

    print("KERNEL_OK")
</pallas_src>

<mosaic_0001>
module attributes {stable_mosaic.version = 11 : i64} {
  func.func @kernel(%arg0: memref<88xf32, #tpu.memory_space<smem>>, %arg1: memref<16x128xf32, #tpu.memory_space<vmem>>, %arg2: memref<1x128xi32, #tpu.memory_space<vmem>>) attributes {dimension_semantics = [], scalar_prefetch = 0 : i64, scratch_operands = 0 : i64, tpu.core_type = #tpu.core_type<tc>} {
    %0 = tpu.iota {dimensions = array<i32: 0>} : vector<16x128xi32>
    %1 = tpu.iota {dimensions = array<i32: 1>} : vector<16x128xi32>
    %c2_i32 = arith.constant 2 : i32
    %2 = vector.broadcast %c2_i32 : i32 to vector<16x128xi32>
    %3 = arith.shrsi %0, %2 : vector<16x128xi32>
    %c1_i32 = arith.constant 1 : i32
    %4 = vector.broadcast %c1_i32 : i32 to vector<16x128xi32>
    %5 = arith.andi %3, %4 : vector<16x128xi32>
    %c1_i32_0 = arith.constant 1 : i32
    %6 = vector.broadcast %c1_i32_0 : i32 to vector<16x128xi32>
    %7 = arith.cmpi eq, %5, %6 : vector<16x128xi32>
    %c3_i32 = arith.constant 3 : i32
    %8 = vector.broadcast %c3_i32 : i32 to vector<16x128xi32>
    %9 = arith.shrsi %0, %8 : vector<16x128xi32>
    %c1_i32_1 = arith.constant 1 : i32
    %10 = vector.broadcast %c1_i32_1 : i32 to vector<16x128xi32>
    %11 = arith.andi %9, %10 : vector<16x128xi32>
    %c1_i32_2 = arith.constant 1 : i32
    %12 = vector.broadcast %c1_i32_2 : i32 to vector<16x128xi32>
    %13 = arith.cmpi eq, %11, %12 : vector<16x128xi32>
    %c6_i32 = arith.constant 6 : i32
    %14 = vector.broadcast %c6_i32 : i32 to vector<16x128xi32>
    %15 = arith.shrsi %1, %14 : vector<16x128xi32>
    %c1_i32_3 = arith.constant 1 : i32
    %16 = vector.broadcast %c1_i32_3 : i32 to vector<16x128xi32>
    %17 = arith.andi %15, %16 : vector<16x128xi32>
    %c1_i32_4 = arith.constant 1 : i32
    %18 = vector.broadcast %c1_i32_4 : i32 to vector<16x128xi32>
    %19 = arith.cmpi eq, %17, %18 : vector<16x128xi32>
    %c0_i32 = arith.constant 0 : i32
    %20 = vector.broadcast %c0_i32 : i32 to vector<16x128xi32>
    %21 = arith.shrsi %0, %20 : vector<16x128xi32>
    %c1_i32_5 = arith.constant 1 : i32
    %22 = vector.broadcast %c1_i32_5 : i32 to vector<16x128xi32>
    %23 = arith.andi %21, %22 : vector<16x128xi32>
    %c1_i32_6 = arith.constant 1 : i32
    %24 = vector.broadcast %c1_i32_6 : i32 to vector<16x128xi32>
    %25 = arith.cmpi eq, %23, %24 : vector<16x128xi32>
    %c1_i32_7 = arith.constant 1 : i32
    %26 = vector.broadcast %c1_i32_7 : i32 to vector<16x128xi32>
    %27 = arith.shrsi %0, %26 : vector<16x128xi32>
    %c1_i32_8 = arith.constant 1 : i32
    %28 = vector.broadcast %c1_i32_8 : i32 to vector<16x128xi32>
    %29 = arith.andi %27, %28 : vector<16x128xi32>
    %c1_i32_9 = arith.constant 1 : i32
    %30 = vector.broadcast %c1_i32_9 : i32 to vector<16x128xi32>
    %31 = arith.cmpi eq, %29, %30 : vector<16x128xi32>
    %c5_i32 = arith.constant 5 : i32
    %32 = vector.broadcast %c5_i32 : i32 to vector<16x128xi32>
    %33 = arith.shrsi %1, %32 : vector<16x128xi32>
    %c1_i32_10 = arith.constant 1 : i32
    %34 = vector.broadcast %c1_i32_10 : i32 to vector<16x128xi32>
    %35 = arith.andi %33, %34 : vector<16x128xi32>
    %c1_i32_11 = arith.constant 1 : i32
    %36 = vector.broadcast %c1_i32_11 : i32 to vector<16x128xi32>
    %37 = arith.cmpi eq, %35, %36 : vector<16x128xi32>
    %c4_i32 = arith.constant 4 : i32
    %38 = vector.broadcast %c4_i32 : i32 to vector<16x128xi32>
    %39 = arith.shrsi %1, %38 : vector<16x128xi32>
    %c1_i32_12 = arith.constant 1 : i32
    %40 = vector.broadcast %c1_i32_12 : i32 to vector<16x128xi32>
    %41 = arith.andi %39, %40 : vector<16x128xi32>
    %c1_i32_13 = arith.constant 1 : i32
    %42 = vector.broadcast %c1_i32_13 : i32 to vector<16x128xi32>
    %43 = arith.cmpi eq, %41, %42 : vector<16x128xi32>
    %c3_i32_14 = arith.constant 3 : i32
    %44 = vector.broadcast %c3_i32_14 : i32 to vector<16x128xi32>
    %45 = arith.shrsi %1, %44 : vector<16x128xi32>
    %c1_i32_15 = arith.constant 1 : i32
    %46 = vector.broadcast %c1_i32_15 : i32 to vector<16x128xi32>
    %47 = arith.andi %45, %46 : vector<16x128xi32>
    %c1_i32_16 = arith.constant 1 : i32
    %48 = vector.broadcast %c1_i32_16 : i32 to vector<16x128xi32>
    %49 = arith.cmpi eq, %47, %48 : vector<16x128xi32>
    %c2_i32_17 = arith.constant 2 : i32
    %50 = vector.broadcast %c2_i32_17 : i32 to vector<16x128xi32>
    %51 = arith.shrsi %1, %50 : vector<16x128xi32>
    %c1_i32_18 = arith.constant 1 : i32
    %52 = vector.broadcast %c1_i32_18 : i32 to vector<16x128xi32>
    %53 = arith.andi %51, %52 : vector<16x128xi32>
    %c1_i32_19 = arith.constant 1 : i32
    %54 = vector.broadcast %c1_i32_19 : i32 to vector<16x128xi32>
    %55 = arith.cmpi eq, %53, %54 : vector<16x128xi32>
    %c1_i32_20 = arith.constant 1 : i32
    %56 = vector.broadcast %c1_i32_20 : i32 to vector<16x128xi32>
    %57 = arith.shrsi %1, %56 : vector<16x128xi32>
    %c1_i32_21 = arith.constant 1 : i32
    %58 = vector.broadcast %c1_i32_21 : i32 to vector<16x128xi32>
    %59 = arith.andi %57, %58 : vector<16x128xi32>
    %c1_i32_22 = arith.constant 1 : i32
    %60 = vector.broadcast %c1_i32_22 : i32 to vector<16x128xi32>
    %61 = arith.cmpi eq, %59, %60 : vector<16x128xi32>
    %c0_i32_23 = arith.constant 0 : i32
    %62 = vector.broadcast %c0_i32_23 : i32 to vector<16x128xi32>
    %63 = arith.shrsi %1, %62 : vector<16x128xi32>
    %c1_i32_24 = arith.constant 1 : i32
    %64 = vector.broadcast %c1_i32_24 : i32 to vector<16x128xi32>
    %65 = arith.andi %63, %64 : vector<16x128xi32>
    %c1_i32_25 = arith.constant 1 : i32
    %66 = vector.broadcast %c1_i32_25 : i32 to vector<16x128xi32>
    %67 = arith.cmpi eq, %65, %66 : vector<16x128xi32>
    %c0_i32_26 = arith.constant 0 : i32
    %68 = vector.broadcast %c0_i32_26 : i32 to vector<16x128xi32>
    %69 = arith.cmpi eq, %0, %68 : vector<16x128xi32>
    %c0_i32_27 = arith.constant 0 : i32
    %70 = vector.broadcast %c0_i32_27 : i32 to vector<16x128xi32>
    %71 = arith.cmpi eq, %1, %70 : vector<16x128xi32>
    %72 = arith.andi %69, %71 : vector<16x128xi1>
    %cst = arith.constant 1.000000e+00 : f32
    %cst_28 = arith.constant 0.000000e+00 : f32
    %73 = vector.broadcast %cst : f32 to vector<16x128xf32>
    %74 = vector.broadcast %cst_28 : f32 to vector<16x128xf32>
    %75 = arith.select %72, %73, %74 : vector<16x128xi1>, vector<16x128xf32>
    %cst_29 = arith.constant 0.000000e+00 : f32
    %76 = vector.broadcast %cst_29 : f32 to vector<16x128xf32>
    %c12_i32 = arith.constant 12 : i32
    %77 = tpu.dynamic_rotate %75 by %c12_i32 dim 0 : vector<16x128xf32>, i32 -> vector<16x128xf32>
    %c4_i32_30 = arith.constant 4 : i32
    %78 = tpu.dynamic_rotate %75 by %c4_i32_30 dim 0 : vector<16x128xf32>, i32 -> vector<16x128xf32>
    %79 = arith.select %7, %78, %77 : vector<16x128xi1>, vector<16x128xf32>
    %c12_i32_31 = arith.constant 12 : i32
    %80 = tpu.dynamic_rotate %76 by %c12_i32_31 dim 0 : vector<16x128xf32>, i32 -> vector<16x128xf32>
    %c4_i32_32 = arith.constant 4 : i32
    %81 = tpu.dynamic_rotate %76 by %c4_i32_32 dim 0 : vector<16x128xf32>, i32 -> vector<16x128xf32>
    %82 = arith.select %7, %81, %80 : vector<16x128xi1>, vector<16x128xf32>
    %83 = arith.subf %79, %75 : vector<16x128xf32>
    %84 = arith.addf %79, %75 : vector<16x128xf32>
    %85 = arith.select %7, %83, %84 : vector<16x128xi1>, vector<16x128xf32>
    %cst_33 = arith.constant 0.707106769 : f32
    %86 = vector.broadcast %cst_33 : f32 to vector<16x128xf32>
    %87 = arith.mulf %86, %85 : vector<16x128xf32>
    %88 = arith.subf %82, %76 : vector<16x128xf32>
    %89 = arith.addf %82, %76 : vector<16x128xf32>
    %90 = arith.select %7, %88, %89 : vector<16x128xi1>, vector<16x128xf32>
    %cst_34 = arith.constant 0.707106769 : f32
    %91 = vector.broadcast %cst_34 : f32 to vector<16x128xf32>
    %92 = arith.mulf %91, %90 : vector<16x128xf32>
    %c8_i32 = arith.constant 8 : i32
    %93 = tpu.dynamic_rotate %87 by %c8_i32 dim 0 : vector<16x128xf32>, i32 -> vector<16x128xf32>
    %c8_i32_35 = arith.constant 8 : i32
    %94 = tpu.dynamic_rotate %92 by %c8_i32_35 dim 0 : vector<16x128xf32>, i32 -> vector<16x128xf32>
    %95 = arith.subf %93, %87 : vector<16x128xf32>
    %96 = arith.addf %93, %87 : vector<16x128xf32>
    %97 = arith.select %13, %95, %96 : vector<16x128xi1>, vector<16x128xf32>
    %cst_36 = arith.constant 0.707106769 : f32
    %98 = vector.broadcast %cst_36 : f32 to vector<16x128xf32>
    %99 = arith.mulf %98, %97 : vector<16x128xf32>
    %100 = arith.subf %94, %92 : vector<16x128xf32>
    %101 = arith.addf %94, %92 : vector<16x128xf32>
    %102 = arith.select %13, %100, %101 : vector<16x128xi1>, vector<16x128xf32>
    %cst_37 = arith.constant 0.707106769 : f32
    %103 = vector.broadcast %cst_37 : f32 to vector<16x128xf32>
    %104 = arith.mulf %103, %102 : vector<16x128xf32>
    %c64_i32 = arith.constant 64 : i32
    %105 = tpu.dynamic_rotate %99 by %c64_i32 dim 1 : vector<16x128xf32>, i32 -> vector<16x128xf32>
    %c64_i32_38 = arith.constant 64 : i32
    %106 = tpu.dynamic_rotate %104 by %c64_i32_38 dim 1 : vector<16x128xf32>, i32 -> vector<16x128xf32>
    %107 = arith.subf %105, %99 : vector<16x128xf32>
    %108 = arith.addf %105, %99 : vector<16x128xf32>
    %109 = arith.select %19, %107, %108 : vector<16x128xi1>, vector<16x128xf32>
    %cst_39 = arith.constant 0.707106769 : f32
    %110 = vector.broadcast %cst_39 : f32 to vector<16x128xf32>
    %111 = arith.mulf %110, %109 : vector<16x128xf32>
    %112 = arith.subf %106, %104 : vector<16x128xf32>
    %113 = arith.addf %106, %104 : vector<16x128xf32>
    %114 = arith.select %19, %112, %113 : vector<16x128xi1>, vector<16x128xf32>
    %cst_40 = arith.constant 0.707106769 : f32
    %115 = vector.broadcast %cst_40 : f32 to vector<16x128xf32>
    %116 = arith.mulf %115, %114 : vector<16x128xf32>
    %c0 = arith.constant 0 : index
    %117 = memref.load %arg0[%c0] : memref<88xf32, #tpu.memory_space<smem>>
    %c1 = arith.constant 1 : index
    %118 = memref.load %arg0[%c1] : memref<88xf32, #tpu.memory_space<smem>>
    %c2 = arith.constant 2 : index
    %119 = memref.load %arg0[%c2] : memref<88xf32, #tpu.memory_space<smem>>
    %c3 = arith.constant 3 : index
    %120 = memref.load %arg0[%c3] : memref<88xf32, #tpu.memory_space<smem>>
    %c4 = arith.constant 4 : index
    %121 = memref.load %arg0[%c4] : memref<88xf32, #tpu.memory_space<smem>>
    %c5 = arith.constant 5 : index
    %122 = memref.load %arg0[%c5] : memref<88xf32, #tpu.memory_space<smem>>
    %c6 = arith.constant 6 : index
    %123 = memref.load %arg0[%c6] : memref<88xf32, #tpu.memory_space<smem>>
    %c7 = arith.constant 7 : index
    %124 = memref.load %arg0[%c7] : memref<88xf32, #tpu.memory_space<smem>>
    %125 = vector.broadcast %123 : f32 to vector<16x128xf32>
    %126 = vector.broadcast %117 : f32 to vector<16x128xf32>
    %127 = arith.select %7, %125, %126 : vector<16x128xi1>, vector<16x128xf32>
    %128 = vector.broadcast %124 : f32 to vector<16x128xf32>
    %129 = vector.broadcast %118 : f32 to vector<16x128xf32>
    %130 = arith.select %7, %128, %129 : vector<16x128xi1>, vector<16x128xf32>
    %131 = vector.broadcast %121 : f32 to vector<16x128xf32>
    %132 = vector.broadcast %119 : f32 to vector<16x128xf32>
    %133 = arith.select %7, %131, %132 : vector<16x128xi1>, vector<16x128xf32>
    %134 = vector.broadcast %122 : f32 to vector<16x128xf32>
    %135 = vector.broadcast %120 : f32 to vector<16x128xf32>
    %136 = arith.select %7, %134, %135 : vector<16x128xi1>, vector<16x128xf32>
    %c12_i32_41 = arith.constant 12 : i32
    %137 = tpu.dynamic_rotate %111 by %c12_i32_41 dim 0 : vector<16x128xf32>, i32 -> vector<16x128xf32>
    %c4_i32_42 = arith.constant 4 : i32
    %138 = tpu.dynamic_rotate %111 by %c4_i32_42 dim 0 : vector<16x128xf32>, i32 -> vector<16x128xf32>
    %139 = arith.select %7, %138, %137 : vector<16x128xi1>, vector<16x128xf32>
    %c12_i32_43 = arith.constant 12 : i32
    %140 = tpu.dynamic_rotate %116 by %c12_i32_43 dim 0 : vector<16x128xf32>, i32 -> vector<16x128xf32>
    %c4_i32_44 = arith.constant 4 : i32
    %141 = tpu.dynamic_rotate %116 by %c4_i32_44 dim 0 : vector<16x128xf32>, i32 -> vector<16x128xf32>
    %142 = arith.select %7, %141, %140 : vector<16x128xi1>, vector<16x128xf32>
    %143 = arith.mulf %127, %111 : vector<16x128xf32>
    %144 = arith.mulf %130, %116 : vector<16x128xf32>
    %145 = arith.subf %143, %144 : vector<16x128xf32>
    %146 = arith.mulf %133, %139 : vector<16x128xf32>
    %147 = arith.addf %145, %146 : vector<16x128xf32>
    %148 = arith.mulf %136, %142 : vector<16x128xf32>
    %149 = arith.subf %147, %148 : vector<16x128xf32>
    %150 = arith.mulf %127, %116 : vector<16x128xf32>
    %151 = arith.mulf %130, %111 : vector<16x128xf32>
    %152 = arith.addf %150, %151 : vector<16x128xf32>
    %153 = arith.mulf %133, %142 : vector<16x128xf32>
    %154 = arith.addf %152, %153 : vector<16x128xf32>
    %155 = arith.mulf %136, %139 : vector<16x128xf32>
    %156 = arith.addf %154, %155 : vector<16x128xf32>
    %c8 = arith.constant 8 : index
    %157 = memref.load %arg0[%c8] : memref<88xf32, #tpu.memory_space<smem>>
    %c9 = arith.constant 9 : index
    %158 = memref.load %arg0[%c9] : memref<88xf32, #tpu.memory_space<smem>>
    %c10 = arith.constant 10 : index
    %159 = memref.load %arg0[%c10] : memref<88xf32, #tpu.memory_space<smem>>
    %c11 = arith.constant 11 : index
    %160 = memref.load %arg0[%c11] : memref<88xf32, #tpu.memory_space<smem>>
    %c12 = arith.constant 12 : index
    %161 = memref.load %arg0[%c12] : memref<88xf32, #tpu.memory_space<smem>>
    %c13 = arith.constant 13 : index
    %162 = memref.load %arg0[%c13] : memref<88xf32, #tpu.memory_space<smem>>
    %c14 = arith.constant 14 : index
    %163 = memref.load %arg0[%c14] : memref<88xf32, #tpu.memory_space<smem>>
    %c15 = arith.constant 15 : index
    %164 = memref.load %arg0[%c15] : memref<88xf32, #tpu.memory_space<smem>>
    %165 = vector.broadcast %163 : f32 to vector<16x128xf32>
    %166 = vector.broadcast %157 : f32 to vector<16x128xf32>
    %167 = arith.select %13, %165, %166 : vector<16x128xi1>, vector<16x128xf32>
    %168 = vector.broadcast %164 : f32 to vector<16x128xf32>
    %169 = vector.broadcast %158 : f32 to vector<16x128xf32>
    %170 = arith.select %13, %168, %169 : vector<16x128xi1>, vector<16x128xf32>
    %171 = vector.broadcast %161 : f32 to vector<16x128xf32>
    %172 = vector.broadcast %159 : f32 to vector<16x128xf32>
    %173 = arith.select %13, %171, %172 : vector<16x128xi1>, vector<16x128xf32>
    %174 = vector.broadcast %162 : f32 to vector<16x128xf32>
    %175 = vector.broadcast %160 : f32 to vector<16x128xf32>
    %176 = arith.select %13, %174, %175 : vector<16x128xi1>, vector<16x128xf32>
    %c8_i32_45 = arith.constant 8 : i32
    %177 = tpu.dynamic_rotate %149 by %c8_i32_45 dim 0 : vector<16x128xf32>, i32 -> vector<16x128xf32>
    %c8_i32_46 = arith.constant 8 : i32
    %178 = tpu.dynamic_rotate %156 by %c8_i32_46 dim 0 : vector<16x128xf32>, i32 -> vector<16x128xf32>
    %179 = arith.mulf %167, %149 : vector<16x128xf32>
    %180 = arith.mulf %170, %156 : vector<16x128xf32>
    %181 = arith.subf %179, %180 : vector<16x128xf32>
    %182 = arith.mulf %173, %177 : vector<16x128xf32>
    %183 = arith.addf %181, %182 : vector<16x128xf32>
    %184 = arith.mulf %176, %178 : vector<16x128xf32>
    %185 = arith.subf %183, %184 : vector<16x128xf32>
    %186 = arith.mulf %167, %156 : vector<16x128xf32>
    %187 = arith.mulf %170, %149 : vector<16x128xf32>
    %188 = arith.addf %186, %187 : vector<16x128xf32>
    %189 = arith.mulf %173, %178 : vector<16x128xf32>
    %190 = arith.addf %188, %189 : vector<16x128xf32>
    %191 = arith.mulf %176, %177 : vector<16x128xf32>
    %192 = arith.addf %190, %191 : vector<16x128xf32>
    %c16 = arith.constant 16 : index
    %193 = memref.load %arg0[%c16] : memref<88xf32, #tpu.memory_space<smem>>
    %c17 = arith.constant 17 : index
    %194 = memref.load %arg0[%c17] : memref<88xf32, #tpu.memory_space<smem>>
    %c18 = arith.constant 18 : index
    %195 = memref.load %arg0[%c18] : memref<88xf32, #tpu.memory_space<smem>>
    %c19 = arith.constant 19 : index
    %196 = memref.load %arg0[%c19] : memref<88xf32, #tpu.memory_space<smem>>
    %c20 = arith.constant 20 : index
    %197 = memref.load %arg0[%c20] : memref<88xf32, #tpu.memory_space<smem>>
    %c21 = arith.constant 21 : index
    %198 = memref.load %arg0[%c21] : memref<88xf32, #tpu.memory_space<smem>>
    %c22 = arith.constant 22 : index
    %199 = memref.load %arg0[%c22] : memref<88xf32, #tpu.memory_space<smem>>
    %c23 = arith.constant 23 : index
    %200 = memref.load %arg0[%c23] : memref<88xf32, #tpu.memory_space<smem>>
    %201 = vector.broadcast %199 : f32 to vector<16x128xf32>
    %202 = vector.broadcast %193 : f32 to vector<16x128xf32>
    %203 = arith.select %19, %201, %202 : vector<16x128xi1>, vector<16x128xf32>
    %204 = vector.broadcast %200 : f32 to vector<16x128xf32>
    %205 = vector.broadcast %194 : f32 to vector<16x128xf32>
    %206 = arith.select %19, %204, %205 : vector<16x128xi1>, vector<16x128xf32>
    %207 = vector.broadcast %197 : f32 to vector<16x128xf32>
    %208 = vector.broadcast %195 : f32 to vector<16x128xf32>
    %209 = arith.select %19, %207, %208 : vector<16x128xi1>, vector<16x128xf32>
    %210 = vector.broadcast %198 : f32 to vector<16x128xf32>
    %211 = vector.broadcast %196 : f32 to vector<16x128xf32>
    %212 = arith.select %19, %210, %211 : vector<16x128xi1>, vector<16x128xf32>
    %c64_i32_47 = arith.constant 64 : i32
    %213 = tpu.dynamic_rotate %185 by %c64_i32_47 dim 1 : vector<16x128xf32>, i32 -> vector<16x128xf32>
    %c64_i32_48 = arith.constant 64 : i32
    %214 = tpu.dynamic_rotate %192 by %c64_i32_48 dim 1 : vector<16x128xf32>, i32 -> vector<16x128xf32>
    %215 = arith.mulf %203, %185 : vector<16x128xf32>
    %216 = arith.mulf %206, %192 : vector<16x128xf32>
    %217 = arith.subf %215, %216 : vector<16x128xf32>
    %218 = arith.mulf %209, %213 : vector<16x128xf32>
    %219 = arith.addf %217, %218 : vector<16x128xf32>
    %220 = arith.mulf %212, %214 : vector<16x128xf32>
    %221 = arith.subf %219, %220 : vector<16x128xf32>
    %222 = arith.mulf %203, %192 : vector<16x128xf32>
    %223 = arith.mulf %206, %185 : vector<16x128xf32>
    %224 = arith.addf %222, %223 : vector<16x128xf32>
    %225 = arith.mulf %209, %214 : vector<16x128xf32>
    %226 = arith.addf %224, %225 : vector<16x128xf32>
    %227 = arith.mulf %212, %213 : vector<16x128xf32>
    %228 = arith.addf %226, %227 : vector<16x128xf32>
    %229 = arith.andi %7, %13 : vector<16x128xi1>
    %230 = arith.andi %13, %19 : vector<16x128xi1>
    %231 = arith.xori %229, %230 : vector<16x128xi1>
    %232 = arith.andi %19, %7 : vector<16x128xi1>
    %233 = arith.xori %231, %232 : vector<16x128xi1>
    %cst_49 = arith.constant 0.000000e+00 : f32
    %234 = vector.broadcast %cst_49 : f32 to vector<16x128xf32>
    %235 = arith.subf %234, %221 : vector<16x128xf32>
    %236 = arith.select %233, %235, %221 : vector<16x128xi1>, vector<16x128xf32>
    %cst_50 = arith.constant 0.000000e+00 : f32
    %237 = vector.broadcast %cst_50 : f32 to vector<16x128xf32>
    %238 = arith.subf %237, %228 : vector<16x128xf32>
    %239 = arith.select %233, %238, %228 : vector<16x128xi1>, vector<16x128xf32>
    %240 = arith.andi %7, %13 : vector<16x128xi1>
    %c15_i32 = arith.constant 15 : i32
    %241 = tpu.dynamic_rotate %236 by %c15_i32 dim 0 : vector<16x128xf32>, i32 -> vector<16x128xf32>
    %c1_i32_51 = arith.constant 1 : i32
    %242 = tpu.dynamic_rotate %236 by %c1_i32_51 dim 0 : vector<16x128xf32>, i32 -> vector<16x128xf32>
    %243 = arith.select %25, %242, %241 : vector<16x128xi1>, vector<16x128xf32>
    %244 = arith.select %240, %243, %236 : vector<16x128xi1>, vector<16x128xf32>
    %c15_i32_52 = arith.constant 15 : i32
    %245 = tpu.dynamic_rotate %239 by %c15_i32_52 dim 0 : vector<16x128xf32>, i32 -> vector<16x128xf32>
    %c1_i32_53 = arith.constant 1 : i32
    %246 = tpu.dynamic_rotate %239 by %c1_i32_53 dim 0 : vector<16x128xf32>, i32 -> vector<16x128xf32>
    %247 = arith.select %25, %246, %245 : vector<16x128xi1>, vector<16x128xf32>
    %248 = arith.select %240, %247, %239 : vector<16x128xi1>, vector<16x128xf32>
    %249 = arith.andi %7, %19 : vector<16x128xi1>
    %c14_i32 = arith.constant 14 : i32
    %250 = tpu.dynamic_rotate %244 by %c14_i32 dim 0 : vector<16x128xf32>, i32 -> vector<16x128xf32>
    %c2_i32_54 = arith.constant 2 : i32
    %251 = tpu.dynamic_rotate %244 by %c2_i32_54 dim 0 : vector<16x128xf32>, i32 -> vector<16x128xf32>
    %252 = arith.select %31, %251, %250 : vector<16x128xi1>, vector<16x128xf32>
    %253 = arith.select %249, %252, %244 : vector<16x128xi1>, vector<16x128xf32>
    %c14_i32_55 = arith.constant 14 : i32
    %254 = tpu.dynamic_rotate %248 by %c14_i32_55 dim 0 : vector<16x128xf32>, i32 -> vector<16x128xf32>
    %c2_i32_56 = arith.constant 2 : i32
    %255 = tpu.dynamic_rotate %248 by %c2_i32_56 dim 0 : vector<16x128xf32>, i32 -> vector<16x128xf32>
    %256 = arith.select %31, %255, %254 : vector<16x128xi1>, vector<16x128xf32>
    %257 = arith.select %249, %256, %248 : vector<16x128xi1>, vector<16x128xf32>
    %c24 = arith.constant 24 : index
    %258 = memref.load %arg0[%c24] : memref<88xf32, #tpu.memory_space<smem>>
    %c25 = arith.constant 25 : index
    %259 = memref.load %arg0[%c25] : memref<88xf32, #tpu.memory_space<smem>>
    %c26 = arith.constant 26 : index
    %260 = memref.load %arg0[%c26] : memref<88xf32, #tpu.memory_space<smem>>
    %c27 = arith.constant 27 : index
    %261 = memref.load %arg0[%c27] : memref<88xf32, #tpu.memory_space<smem>>
    %c28 = arith.constant 28 : index
    %262 = memref.load %arg0[%c28] : memref<88xf32, #tpu.memory_space<smem>>
    %c29 = arith.constant 29 : index
    %263 = memref.load %arg0[%c29] : memref<88xf32, #tpu.memory_space<smem>>
    %c30 = arith.constant 30 : index
    %264 = memref.load %arg0[%c30] : memref<88xf32, #tpu.memory_space<smem>>
    %c31 = arith.constant 31 : index
    %265 = memref.load %arg0[%c31] : memref<88xf32, #tpu.memory_space<smem>>
    %266 = vector.broadcast %264 : f32 to vector<16x128xf32>
    %267 = vector.broadcast %258 : f32 to vector<16x128xf32>
    %268 = arith.select %25, %266, %267 : vector<16x128xi1>, vector<16x128xf32>
    %269 = vector.broadcast %265 : f32 to vector<16x128xf32>
    %270 = vector.broadcast %259 : f32 to vector<16x128xf32>
    %271 = arith.select %25, %269, %270 : vector<16x128xi1>, vector<16x128xf32>
    %272 = vector.broadcast %262 : f32 to vector<16x128xf32>
    %273 = vector.broadcast %260 : f32 to vector<16x128xf32>
    %274 = arith.select %25, %272, %273 : vector<16x128xi1>, vector<16x128xf32>
    %275 = vector.broadcast %263 : f32 to vector<16x128xf32>
    %276 = vector.broadcast %261 : f32 to vector<16x128xf32>
    %277 = arith.select %25, %275, %276 : vector<16x128xi1>, vector<16x128xf32>
    %c15_i32_57 = arith.constant 15 : i32
    %278 = tpu.dynamic_rotate %253 by %c15_i32_57 dim 0 : vector<16x128xf32>, i32 -> vector<16x128xf32>
    %c1_i32_58 = arith.constant 1 : i32
    %279 = tpu.dynamic_rotate %253 by %c1_i32_58 dim 0 : vector<16x128xf32>, i32 -> vector<16x128xf32>
    %280 = arith.select %25, %279, %278 : vector<16x128xi1>, vector<16x128xf32>
    %c15_i32_59 = arith.constant 15 : i32
    %281 = tpu.dynamic_rotate %257 by %c15_i32_59 dim 0 : vector<16x128xf32>, i32 -> vector<16x128xf32>
    %c1_i32_60 = arith.constant 1 : i32
    %282 = tpu.dynamic_rotate %257 by %c1_i32_60 dim 0 : vector<16x128xf32>, i32 -> vector<16x128xf32>
    %283 = arith.select %25, %282, %281 : vector<16x128xi1>, vector<16x128xf32>
    %284 = arith.mulf %268, %253 : vector<16x128xf32>
    %285 = arith.mulf %271, %257 : vector<16x128xf32>
    %286 = arith.subf %284, %285 : vector<16x128xf32>
    %287 = arith.mulf %274, %280 : vector<16x128xf32>
    %288 = arith.addf %286, %287 : vector<16x128xf32>
    %289 = arith.mulf %277, %283 : vector<16x128xf32>
    %290 = arith.subf %288, %289 : vector<16x128xf32>
    %291 = arith.mulf %268, %257 : vector<16x128xf32>
    %292 = arith.mulf %271, %253 : vector<16x128xf32>
    %293 = arith.addf %291, %292 : vector<16x128xf32>
    %294 = arith.mulf %274, %283 : vector<16x128xf32>
    %295 = arith.addf %293, %294 : vector<16x128xf32>
    %296 = arith.mulf %277, %280 : vector<16x128xf32>
    %297 = arith.addf %295, %296 : vector<16x128xf32>
    %c32 = arith.constant 32 : index
    %298 = memref.load %arg0[%c32] : memref<88xf32, #tpu.memory_space<smem>>
    %c33 = arith.constant 33 : index
    %299 = memref.load %arg0[%c33] : memref<88xf32, #tpu.memory_space<smem>>
    %c34 = arith.constant 34 : index
    %300 = memref.load %arg0[%c34] : memref<88xf32, #tpu.memory_space<smem>>
    %c35 = arith.constant 35 : index
    %301 = memref.load %arg0[%c35] : memref<88xf32, #tpu.memory_space<smem>>
    %c36 = arith.constant 36 : index
    %302 = memref.load %arg0[%c36] : memref<88xf32, #tpu.memory_space<smem>>
    %c37 = arith.constant 37 : index
    %303 = memref.load %arg0[%c37] : memref<88xf32, #tpu.memory_space<smem>>
    %c38 = arith.constant 38 : index
    %304 = memref.load %arg0[%c38] : memref<88xf32, #tpu.memory_space<smem>>
    %c39 = arith.constant 39 : index
    %305 = memref.load %arg0[%c39] : memref<88xf32, #tpu.memory_space<smem>>
    %306 = vector.broadcast %304 : f32 to vector<16x128xf32>
    %307 = vector.broadcast %298 : f32 to vector<16x128xf32>
    %308 = arith.select %31, %306, %307 : vector<16x128xi1>, vector<16x128xf32>
    %309 = vector.broadcast %305 : f32 to vector<16x128xf32>
    %310 = vector.broadcast %299 : f32 to vector<16x128xf32>
    %311 = arith.select %31, %309, %310 : vector<16x128xi1>, vector<16x128xf32>
    %312 = vector.broadcast %302 : f32 to vector<16x128xf32>
    %313 = vector.broadcast %300 : f32 to vector<16x128xf32>
    %314 = arith.select %31, %312, %313 : vector<16x128xi1>, vector<16x128xf32>
    %315 = vector.broadcast %303 : f32 to vector<16x128xf32>
    %316 = vector.broadcast %301 : f32 to vector<16x128xf32>
    %317 = arith.select %31, %315, %316 : vector<16x128xi1>, vector<16x128xf32>
    %c14_i32_61 = arith.constant 14 : i32
    %318 = tpu.dynamic_rotate %290 by %c14_i32_61 dim 0 : vector<16x128xf32>, i32 -> vector<16x128xf32>
    %c2_i32_62 = arith.constant 2 : i32
    %319 = tpu.dynamic_rotate %290 by %c2_i32_62 dim 0 : vector<16x128xf32>, i32 -> vector<16x128xf32>
    %320 = arith.select %31, %319, %318 : vector<16x128xi1>, vector<16x128xf32>
    %c14_i32_63 = arith.constant 14 : i32
    %321 = tpu.dynamic_rotate %297 by %c14_i32_63 dim 0 : vector<16x128xf32>, i32 -> vector<16x128xf32>
    %c2_i32_64 = arith.constant 2 : i32
    %322 = tpu.dynamic_rotate %297 by %c2_i32_64 dim 0 : vector<16x128xf32>, i32 -> vector<16x128xf32>
    %323 = arith.select %31, %322, %321 : vector<16x128xi1>, vector<16x128xf32>
    %324 = arith.mulf %308, %290 : vector<16x128xf32>
    %325 = arith.mulf %311, %297 : vector<16x128xf32>
    %326 = arith.subf %324, %325 : vector<16x128xf32>
    %327 = arith.mulf %314, %320 : vector<16x128xf32>
    %328 = arith.addf %326, %327 : vector<16x128xf32>
    %329 = arith.mulf %317, %323 : vector<16x128xf32>
    %330 = arith.subf %328, %329 : vector<16x128xf32>
    %331 = arith.mulf %308, %297 : vector<16x128xf32>
    %332 = arith.mulf %311, %290 : vector<16x128xf32>
    %333 = arith.addf %331, %332 : vector<16x128xf32>
    %334 = arith.mulf %314, %323 : vector<16x128xf32>
    %335 = arith.addf %333, %334 : vector<16x128xf32>
    %336 = arith.mulf %317, %320 : vector<16x128xf32>
    %337 = arith.addf %335, %336 : vector<16x128xf32>
    %338 = arith.andi %25, %31 : vector<16x128xi1>
    %cst_65 = arith.constant 0.000000e+00 : f32
    %339 = vector.broadcast %cst_65 : f32 to vector<16x128xf32>
    %340 = arith.subf %339, %330 : vector<16x128xf32>
    %341 = arith.select %338, %340, %330 : vector<16x128xi1>, vector<16x128xf32>
    %cst_66 = arith.constant 0.000000e+00 : f32
    %342 = vector.broadcast %cst_66 : f32 to vector<16x128xf32>
    %343 = arith.subf %342, %337 : vector<16x128xf32>
    %344 = arith.select %338, %343, %337 : vector<16x128xi1>, vector<16x128xf32>
    %c96_i32 = arith.constant 96 : i32
    %345 = tpu.dynamic_rotate %341 by %c96_i32 dim 1 : vector<16x128xf32>, i32 -> vector<16x128xf32>
    %c32_i32 = arith.constant 32 : i32
    %346 = tpu.dynamic_rotate %341 by %c32_i32 dim 1 : vector<16x128xf32>, i32 -> vector<16x128xf32>
    %347 = arith.select %37, %346, %345 : vector<16x128xi1>, vector<16x128xf32>
    %348 = arith.select %25, %347, %341 : vector<16x128xi1>, vector<16x128xf32>
    %c96_i32_67 = arith.constant 96 : i32
    %349 = tpu.dynamic_rotate %344 by %c96_i32_67 dim 1 : vector<16x128xf32>, i32 -> vector<16x128xf32>
    %c32_i32_68 = arith.constant 32 : i32
    %350 = tpu.dynamic_rotate %344 by %c32_i32_68 dim 1 : vector<16x128xf32>, i32 -> vector<16x128xf32>
    %351 = arith.select %37, %350, %349 : vector<16x128xi1>, vector<16x128xf32>
    %352 = arith.select %25, %351, %344 : vector<16x128xi1>, vector<16x128xf32>
    %c120_i32 = arith.constant 120 : i32
    %353 = tpu.dynamic_rotate %348 by %c120_i32 dim 1 : vector<16x128xf32>, i32 -> vector<16x128xf32>
    %c8_i32_69 = arith.constant 8 : i32
    %354 = tpu.dynamic_rotate %348 by %c8_i32_69 dim 1 : vector<16x128xf32>, i32 -> vector<16x128xf32>
    %355 = arith.select %49, %354, %353 : vector<16x128xi1>, vector<16x128xf32>
    %356 = arith.select %25, %355, %348 : vector<16x128xi1>, vector<16x128xf32>
    %c120_i32_70 = arith.constant 120 : i32
    %357 = tpu.dynamic_rotate %352 by %c120_i32_70 dim 1 : vector<16x128xf32>, i32 -> vector<16x128xf32>
    %c8_i32_71 = arith.constant 8 : i32
    %358 = tpu.dynamic_rotate %352 by %c8_i32_71 dim 1 : vector<16x128xf32>, i32 -> vector<16x128xf32>
    %359 = arith.select %49, %358, %357 : vector<16x128xi1>, vector<16x128xf32>
    %360 = arith.select %25, %359, %352 : vector<16x128xi1>, vector<16x128xf32>
    %c112_i32 = arith.constant 112 : i32
    %361 = tpu.dynamic_rotate %356 by %c112_i32 dim 1 : vector<16x128xf32>, i32 -> vector<16x128xf32>
    %c16_i32 = arith.constant 16 : i32
    %362 = tpu.dynamic_rotate %356 by %c16_i32 dim 1 : vector<16x128xf32>, i32 -> vector<16x128xf32>
    %363 = arith.select %43, %362, %361 : vector<16x128xi1>, vector<16x128xf32>
    %364 = arith.select %31, %363, %356 : vector<16x128xi1>, vector<16x128xf32>
    %c112_i32_72 = arith.constant 112 : i32
    %365 = tpu.dynamic_rotate %360 by %c112_i32_72 dim 1 : vector<16x128xf32>, i32 -> vector<16x128xf32>
    %c16_i32_73 = arith.constant 16 : i32
    %366 = tpu.dynamic_rotate %360 by %c16_i32_73 dim 1 : vector<16x128xf32>, i32 -> vector<16x128xf32>
    %367 = arith.select %43, %366, %365 : vector<16x128xi1>, vector<16x128xf32>
    %368 = arith.select %31, %367, %360 : vector<16x128xi1>, vector<16x128xf32>
    %c124_i32 = arith.constant 124 : i32
    %369 = tpu.dynamic_rotate %364 by %c124_i32 dim 1 : vector<16x128xf32>, i32 -> vector<16x128xf32>
    %c4_i32_74 = arith.constant 4 : i32
    %370 = tpu.dynamic_rotate %364 by %c4_i32_74 dim 1 : vector<16x128xf32>, i32 -> vector<16x128xf32>
    %371 = arith.select %55, %370, %369 : vector<16x128xi1>, vector<16x128xf32>
    %372 = arith.select %31, %371, %364 : vector<16x128xi1>, vector<16x128xf32>
    %c124_i32_75 = arith.constant 124 : i32
    %373 = tpu.dynamic_rotate %368 by %c124_i32_75 dim 1 : vector<16x128xf32>, i32 -> vector<16x128xf32>
    %c4_i32_76 = arith.constant 4 : i32
    %374 = tpu.dynamic_rotate %368 by %c4_i32_76 dim 1 : vector<16x128xf32>, i32 -> vector<16x128xf32>
    %375 = arith.select %55, %374, %373 : vector<16x128xi1>, vector<16x128xf32>
    %376 = arith.select %31, %375, %368 : vector<16x128xi1>, vector<16x128xf32>
    %c40 = arith.constant 40 : index
    %377 = memref.load %arg0[%c40] : memref<88xf32, #tpu.memory_space<smem>>
    %c41 = arith.constant 41 : index
    %378 = memref.load %arg0[%c41] : memref<88xf32, #tpu.memory_space<smem>>
    %c42 = arith.constant 42 : index
    %379 = memref.load %arg0[%c42] : memref<88xf32, #tpu.memory_space<smem>>
    %c43 = arith.constant 43 : index
    %380 = memref.load %arg0[%c43] : memref<88xf32, #tpu.memory_space<smem>>
    %c44 = arith.constant 44 : index
    %381 = memref.load %arg0[%c44] : memref<88xf32, #tpu.memory_space<smem>>
    %c45 = arith.constant 45 : index
    %382 = memref.load %arg0[%c45] : memref<88xf32, #tpu.memory_space<smem>>
    %c46 = arith.constant 46 : index
    %383 = memref.load %arg0[%c46] : memref<88xf32, #tpu.memory_space<smem>>
    %c47 = arith.constant 47 : index
    %384 = memref.load %arg0[%c47] : memref<88xf32, #tpu.memory_space<smem>>
    %385 = vector.broadcast %383 : f32 to vector<16x128xf32>
    %386 = vector.broadcast %377 : f32 to vector<16x128xf32>
    %387 = arith.select %37, %385, %386 : vector<16x128xi1>, vector<16x128xf32>
    %388 = vector.broadcast %384 : f32 to vector<16x128xf32>
    %389 = vector.broadcast %378 : f32 to vector<16x128xf32>
    %390 = arith.select %37, %388, %389 : vector<16x128xi1>, vector<16x128xf32>
    %391 = vector.broadcast %381 : f32 to vector<16x128xf32>
    %392 = vector.broadcast %379 : f32 to vector<16x128xf32>
    %393 = arith.select %37, %391, %392 : vector<16x128xi1>, vector<16x128xf32>
    %394 = vector.broadcast %382 : f32 to vector<16x128xf32>
    %395 = vector.broadcast %380 : f32 to vector<16x128xf32>
    %396 = arith.select %37, %394, %395 : vector<16x128xi1>, vector<16x128xf32>
    %c96_i32_77 = arith.constant 96 : i32
    %397 = tpu.dynamic_rotate %372 by %c96_i32_77 dim 1 : vector<16x128xf32>, i32 -> vector<16x128xf32>
    %c32_i32_78 = arith.constant 32 : i32
    %398 = tpu.dynamic_rotate %372 by %c32_i32_78 dim 1 : vector<16x128xf32>, i32 -> vector<16x128xf32>
    %399 = arith.select %37, %398, %397 : vector<16x128xi1>, vector<16x128xf32>
    %c96_i32_79 = arith.constant 96 : i32
    %400 = tpu.dynamic_rotate %376 by %c96_i32_79 dim 1 : vector<16x128xf32>, i32 -> vector<16x128xf32>
    %c32_i32_80 = arith.constant 32 : i32
    %401 = tpu.dynamic_rotate %376 by %c32_i32_80 dim 1 : vector<16x128xf32>, i32 -> vector<16x128xf32>
    %402 = arith.select %37, %401, %400 : vector<16x128xi1>, vector<16x128xf32>
    %403 = arith.mulf %387, %372 : vector<16x128xf32>
    %404 = arith.mulf %390, %376 : vector<16x128xf32>
    %405 = arith.subf %403, %404 : vector<16x128xf32>
    %406 = arith.mulf %393, %399 : vector<16x128xf32>
    %407 = arith.addf %405, %406 : vector<16x128xf32>
    %408 = arith.mulf %396, %402 : vector<16x128xf32>
    %409 = arith.subf %407, %408 : vector<16x128xf32>
    %410 = arith.mulf %387, %376 : vector<16x128xf32>
    %411 = arith.mulf %390, %372 : vector<16x128xf32>
    %412 = arith.addf %410, %411 : vector<16x128xf32>
    %413 = arith.mulf %393, %402 : vector<16x128xf32>
    %414 = arith.addf %412, %413 : vector<16x128xf32>
    %415 = arith.mulf %396, %399 : vector<16x128xf32>
    %416 = arith.addf %414, %415 : vector<16x128xf32>
    %c48 = arith.constant 48 : index
    %417 = memref.load %arg0[%c48] : memref<88xf32, #tpu.memory_space<smem>>
    %c49 = arith.constant 49 : index
    %418 = memref.load %arg0[%c49] : memref<88xf32, #tpu.memory_space<smem>>
    %c50 = arith.constant 50 : index
    %419 = memref.load %arg0[%c50] : memref<88xf32, #tpu.memory_space<smem>>
    %c51 = arith.constant 51 : index
    %420 = memref.load %arg0[%c51] : memref<88xf32, #tpu.memory_space<smem>>
    %c52 = arith.constant 52 : index
    %421 = memref.load %arg0[%c52] : memref<88xf32, #tpu.memory_space<smem>>
    %c53 = arith.constant 53 : index
    %422 = memref.load %arg0[%c53] : memref<88xf32, #tpu.memory_space<smem>>
    %c54 = arith.constant 54 : index
    %423 = memref.load %arg0[%c54] : memref<88xf32, #tpu.memory_space<smem>>
    %c55 = arith.constant 55 : index
    %424 = memref.load %arg0[%c55] : memref<88xf32, #tpu.memory_space<smem>>
    %425 = vector.broadcast %423 : f32 to vector<16x128xf32>
    %426 = vector.broadcast %417 : f32 to vector<16x128xf32>
    %427 = arith.select %49, %425, %426 : vector<16x128xi1>, vector<16x128xf32>
    %428 = vector.broadcast %424 : f32 to vector<16x128xf32>
    %429 = vector.broadcast %418 : f32 to vector<16x128xf32>
    %430 = arith.select %49, %428, %429 : vector<16x128xi1>, vector<16x128xf32>
    %431 = vector.broadcast %421 : f32 to vector<16x128xf32>
    %432 = vector.broadcast %419 : f32 to vector<16x128xf32>
    %433 = arith.select %49, %431, %432 : vector<16x128xi1>, vector<16x128xf32>
    %434 = vector.broadcast %422 : f32 to vector<16x128xf32>
    %435 = vector.broadcast %420 : f32 to vector<16x128xf32>
    %436 = arith.select %49, %434, %435 : vector<16x128xi1>, vector<16x128xf32>
    %c120_i32_81 = arith.constant 120 : i32
    %437 = tpu.dynamic_rotate %409 by %c120_i32_81 dim 1 : vector<16x128xf32>, i32 -> vector<16x128xf32>
    %c8_i32_82 = arith.constant 8 : i32
    %438 = tpu.dynamic_rotate %409 by %c8_i32_82 dim 1 : vector<16x128xf32>, i32 -> vector<16x128xf32>
    %439 = arith.select %49, %438, %437 : vector<16x128xi1>, vector<16x128xf32>
    %c120_i32_83 = arith.constant 120 : i32
    %440 = tpu.dynamic_rotate %416 by %c120_i32_83 dim 1 : vector<16x128xf32>, i32 -> vector<16x128xf32>
    %c8_i32_84 = arith.constant 8 : i32
    %441 = tpu.dynamic_rotate %416 by %c8_i32_84 dim 1 : vector<16x128xf32>, i32 -> vector<16x128xf32>
    %442 = arith.select %49, %441, %440 : vector<16x128xi1>, vector<16x128xf32>
    %443 = arith.mulf %427, %409 : vector<16x128xf32>
    %444 = arith.mulf %430, %416 : vector<16x128xf32>
    %445 = arith.subf %443, %444 : vector<16x128xf32>
    %446 = arith.mulf %433, %439 : vector<16x128xf32>
    %447 = arith.addf %445, %446 : vector<16x128xf32>
    %448 = arith.mulf %436, %442 : vector<16x128xf32>
    %449 = arith.subf %447, %448 : vector<16x128xf32>
    %450 = arith.mulf %427, %416 : vector<16x128xf32>
    %451 = arith.mulf %430, %409 : vector<16x128xf32>
    %452 = arith.addf %450, %451 : vector<16x128xf32>
    %453 = arith.mulf %433, %442 : vector<16x128xf32>
    %454 = arith.addf %452, %453 : vector<16x128xf32>
    %455 = arith.mulf %436, %439 : vector<16x128xf32>
    %456 = arith.addf %454, %455 : vector<16x128xf32>
    %c56 = arith.constant 56 : index
    %457 = memref.load %arg0[%c56] : memref<88xf32, #tpu.memory_space<smem>>
    %c57 = arith.constant 57 : index
    %458 = memref.load %arg0[%c57] : memref<88xf32, #tpu.memory_space<smem>>
    %c58 = arith.constant 58 : index
    %459 = memref.load %arg0[%c58] : memref<88xf32, #tpu.memory_space<smem>>
    %c59 = arith.constant 59 : index
    %460 = memref.load %arg0[%c59] : memref<88xf32, #tpu.memory_space<smem>>
    %c60 = arith.constant 60 : index
    %461 = memref.load %arg0[%c60] : memref<88xf32, #tpu.memory_space<smem>>
    %c61 = arith.constant 61 : index
    %462 = memref.load %arg0[%c61] : memref<88xf32, #tpu.memory_space<smem>>
    %c62 = arith.constant 62 : index
    %463 = memref.load %arg0[%c62] : memref<88xf32, #tpu.memory_space<smem>>
    %c63 = arith.constant 63 : index
    %464 = memref.load %arg0[%c63] : memref<88xf32, #tpu.memory_space<smem>>
    %465 = vector.broadcast %463 : f32 to vector<16x128xf32>
    %466 = vector.broadcast %457 : f32 to vector<16x128xf32>
    %467 = arith.select %43, %465, %466 : vector<16x128xi1>, vector<16x128xf32>
    %468 = vector.broadcast %464 : f32 to vector<16x128xf32>
    %469 = vector.broadcast %458 : f32 to vector<16x128xf32>
    %470 = arith.select %43, %468, %469 : vector<16x128xi1>, vector<16x128xf32>
    %471 = vector.broadcast %461 : f32 to vector<16x128xf32>
    %472 = vector.broadcast %459 : f32 to vector<16x128xf32>
    %473 = arith.select %43, %471, %472 : vector<16x128xi1>, vector<16x128xf32>
    %474 = vector.broadcast %462 : f32 to vector<16x128xf32>
    %475 = vector.broadcast %460 : f32 to vector<16x128xf32>
    %476 = arith.select %43, %474, %475 : vector<16x128xi1>, vector<16x128xf32>
    %c112_i32_85 = arith.constant 112 : i32
    %477 = tpu.dynamic_rotate %449 by %c112_i32_85 dim 1 : vector<16x128xf32>, i32 -> vector<16x128xf32>
    %c16_i32_86 = arith.constant 16 : i32
    %478 = tpu.dynamic_rotate %449 by %c16_i32_86 dim 1 : vector<16x128xf32>, i32 -> vector<16x128xf32>
    %479 = arith.select %43, %478, %477 : vector<16x128xi1>, vector<16x128xf32>
    %c112_i32_87 = arith.constant 112 : i32
    %480 = tpu.dynamic_rotate %456 by %c112_i32_87 dim 1 : vector<16x128xf32>, i32 -> vector<16x128xf32>
    %c16_i32_88 = arith.constant 16 : i32
    %481 = tpu.dynamic_rotate %456 by %c16_i32_88 dim 1 : vector<16x128xf32>, i32 -> vector<16x128xf32>
    %482 = arith.select %43, %481, %480 : vector<16x128xi1>, vector<16x128xf32>
    %483 = arith.mulf %467, %449 : vector<16x128xf32>
    %484 = arith.mulf %470, %456 : vector<16x128xf32>
    %485 = arith.subf %483, %484 : vector<16x128xf32>
    %486 = arith.mulf %473, %479 : vector<16x128xf32>
    %487 = arith.addf %485, %486 : vector<16x128xf32>
    %488 = arith.mulf %476, %482 : vector<16x128xf32>
    %489 = arith.subf %487, %488 : vector<16x128xf32>
    %490 = arith.mulf %467, %456 : vector<16x128xf32>
    %491 = arith.mulf %470, %449 : vector<16x128xf32>
    %492 = arith.addf %490, %491 : vector<16x128xf32>
    %493 = arith.mulf %473, %482 : vector<16x128xf32>
    %494 = arith.addf %492, %493 : vector<16x128xf32>
    %495 = arith.mulf %476, %479 : vector<16x128xf32>
    %496 = arith.addf %494, %495 : vector<16x128xf32>
    %c64 = arith.constant 64 : index
    %497 = memref.load %arg0[%c64] : memref<88xf32, #tpu.memory_space<smem>>
    %c65 = arith.constant 65 : index
    %498 = memref.load %arg0[%c65] : memref<88xf32, #tpu.memory_space<smem>>
    %c66 = arith.constant 66 : index
    %499 = memref.load %arg0[%c66] : memref<88xf32, #tpu.memory_space<smem>>
    %c67 = arith.constant 67 : index
    %500 = memref.load %arg0[%c67] : memref<88xf32, #tpu.memory_space<smem>>
    %c68 = arith.constant 68 : index
    %501 = memref.load %arg0[%c68] : memref<88xf32, #tpu.memory_space<smem>>
    %c69 = arith.constant 69 : index
    %502 = memref.load %arg0[%c69] : memref<88xf32, #tpu.memory_space<smem>>
    %c70 = arith.constant 70 : index
    %503 = memref.load %arg0[%c70] : memref<88xf32, #tpu.memory_space<smem>>
    %c71 = arith.constant 71 : index
    %504 = memref.load %arg0[%c71] : memref<88xf32, #tpu.memory_space<smem>>
    %505 = vector.broadcast %503 : f32 to vector<16x128xf32>
    %506 = vector.broadcast %497 : f32 to vector<16x128xf32>
    %507 = arith.select %55, %505, %506 : vector<16x128xi1>, vector<16x128xf32>
    %508 = vector.broadcast %504 : f32 to vector<16x128xf32>
    %509 = vector.broadcast %498 : f32 to vector<16x128xf32>
    %510 = arith.select %55, %508, %509 : vector<16x128xi1>, vector<16x128xf32>
    %511 = vector.broadcast %501 : f32 to vector<16x128xf32>
    %512 = vector.broadcast %499 : f32 to vector<16x128xf32>
    %513 = arith.select %55, %511, %512 : vector<16x128xi1>, vector<16x128xf32>
    %514 = vector.broadcast %502 : f32 to vector<16x128xf32>
    %515 = vector.broadcast %500 : f32 to vector<16x128xf32>
    %516 = arith.select %55, %514, %515 : vector<16x128xi1>, vector<16x128xf32>
    %c124_i32_89 = arith.constant 124 : i32
    %517 = tpu.dynamic_rotate %489 by %c124_i32_89 dim 1 : vector<16x128xf32>, i32 -> vector<16x128xf32>
    %c4_i32_90 = arith.constant 4 : i32
    %518 = tpu.dynamic_rotate %489 by %c4_i32_90 dim 1 : vector<16x128xf32>, i32 -> vector<16x128xf32>
    %519 = arith.select %55, %518, %517 : vector<16x128xi1>, vector<16x128xf32>
    %c124_i32_91 = arith.constant 124 : i32
    %520 = tpu.dynamic_rotate %496 by %c124_i32_91 dim 1 : vector<16x128xf32>, i32 -> vector<16x128xf32>
    %c4_i32_92 = arith.constant 4 : i32
    %521 = tpu.dynamic_rotate %496 by %c4_i32_92 dim 1 : vector<16x128xf32>, i32 -> vector<16x128xf32>
    %522 = arith.select %55, %521, %520 : vector<16x128xi1>, vector<16x128xf32>
    %523 = arith.mulf %507, %489 : vector<16x128xf32>
    %524 = arith.mulf %510, %496 : vector<16x128xf32>
    %525 = arith.subf %523, %524 : vector<16x128xf32>
    %526 = arith.mulf %513, %519 : vector<16x128xf32>
    %527 = arith.addf %525, %526 : vector<16x128xf32>
    %528 = arith.mulf %516, %522 : vector<16x128xf32>
    %529 = arith.subf %527, %528 : vector<16x128xf32>
    %530 = arith.mulf %507, %496 : vector<16x128xf32>
    %531 = arith.mulf %510, %489 : vector<16x128xf32>
    %532 = arith.addf %530, %531 : vector<16x128xf32>
    %533 = arith.mulf %513, %522 : vector<16x128xf32>
    %534 = arith.addf %532, %533 : vector<16x128xf32>
    %535 = arith.mulf %516, %519 : vector<16x128xf32>
    %536 = arith.addf %534, %535 : vector<16x128xf32>
    %c8_i32_93 = arith.constant 8 : i32
    %537 = tpu.dynamic_rotate %529 by %c8_i32_93 dim 0 : vector<16x128xf32>, i32 -> vector<16x128xf32>
    %538 = arith.select %37, %537, %529 : vector<16x128xi1>, vector<16x128xf32>
    %c8_i32_94 = arith.constant 8 : i32
    %539 = tpu.dynamic_rotate %536 by %c8_i32_94 dim 0 : vector<16x128xf32>, i32 -> vector<16x128xf32>
    %540 = arith.select %37, %539, %536 : vector<16x128xi1>, vector<16x128xf32>
    %c64_i32_95 = arith.constant 64 : i32
    %541 = tpu.dynamic_rotate %538 by %c64_i32_95 dim 1 : vector<16x128xf32>, i32 -> vector<16x128xf32>
    %542 = arith.select %43, %541, %538 : vector<16x128xi1>, vector<16x128xf32>
    %c64_i32_96 = arith.constant 64 : i32
    %543 = tpu.dynamic_rotate %540 by %c64_i32_96 dim 1 : vector<16x128xf32>, i32 -> vector<16x128xf32>
    %544 = arith.select %43, %543, %540 : vector<16x128xi1>, vector<16x128xf32>
    %545 = arith.andi %7, %13 : vector<16x128xi1>
    %c126_i32 = arith.constant 126 : i32
    %546 = tpu.dynamic_rotate %542 by %c126_i32 dim 1 : vector<16x128xf32>, i32 -> vector<16x128xf32>
    %c2_i32_97 = arith.constant 2 : i32
    %547 = tpu.dynamic_rotate %542 by %c2_i32_97 dim 1 : vector<16x128xf32>, i32 -> vector<16x128xf32>
    %548 = arith.select %61, %547, %546 : vector<16x128xi1>, vector<16x128xf32>
    %549 = arith.select %545, %548, %542 : vector<16x128xi1>, vector<16x128xf32>
    %c126_i32_98 = arith.constant 126 : i32
    %550 = tpu.dynamic_rotate %544 by %c126_i32_98 dim 1 : vector<16x128xf32>, i32 -> vector<16x128xf32>
    %c2_i32_99 = arith.constant 2 : i32
    %551 = tpu.dynamic_rotate %544 by %c2_i32_99 dim 1 : vector<16x128xf32>, i32 -> vector<16x128xf32>
    %552 = arith.select %61, %551, %550 : vector<16x128xi1>, vector<16x128xf32>
    %553 = arith.select %545, %552, %544 : vector<16x128xi1>, vector<16x128xf32>
    %554 = arith.andi %7, %19 : vector<16x128xi1>
    %c127_i32 = arith.constant 127 : i32
    %555 = tpu.dynamic_rotate %549 by %c127_i32 dim 1 : vector<16x128xf32>, i32 -> vector<16x128xf32>
    %c1_i32_100 = arith.constant 1 : i32
    %556 = tpu.dynamic_rotate %549 by %c1_i32_100 dim 1 : vector<16x128xf32>, i32 -> vector<16x128xf32>
    %557 = arith.select %67, %556, %555 : vector<16x128xi1>, vector<16x128xf32>
    %558 = arith.select %554, %557, %549 : vector<16x128xi1>, vector<16x128xf32>
    %c127_i32_101 = arith.constant 127 : i32
    %559 = tpu.dynamic_rotate %553 by %c127_i32_101 dim 1 : vector<16x128xf32>, i32 -> vector<16x128xf32>
    %c1_i32_102 = arith.constant 1 : i32
    %560 = tpu.dynamic_rotate %553 by %c1_i32_102 dim 1 : vector<16x128xf32>, i32 -> vector<16x128xf32>
    %561 = arith.select %67, %560, %559 : vector<16x128xi1>, vector<16x128xf32>
    %562 = arith.select %554, %561, %553 : vector<16x128xi1>, vector<16x128xf32>
    %c72 = arith.constant 72 : index
    %563 = memref.load %arg0[%c72] : memref<88xf32, #tpu.memory_space<smem>>
    %c73 = arith.constant 73 : index
    %564 = memref.load %arg0[%c73] : memref<88xf32, #tpu.memory_space<smem>>
    %c74 = arith.constant 74 : index
    %565 = memref.load %arg0[%c74] : memref<88xf32, #tpu.memory_space<smem>>
    %c75 = arith.constant 75 : index
    %566 = memref.load %arg0[%c75] : memref<88xf32, #tpu.memory_space<smem>>
    %c76 = arith.constant 76 : index
    %567 = memref.load %arg0[%c76] : memref<88xf32, #tpu.memory_space<smem>>
    %c77 = arith.constant 77 : index
    %568 = memref.load %arg0[%c77] : memref<88xf32, #tpu.memory_space<smem>>
    %c78 = arith.constant 78 : index
    %569 = memref.load %arg0[%c78] : memref<88xf32, #tpu.memory_space<smem>>
    %c79 = arith.constant 79 : index
    %570 = memref.load %arg0[%c79] : memref<88xf32, #tpu.memory_space<smem>>
    %571 = vector.broadcast %569 : f32 to vector<16x128xf32>
    %572 = vector.broadcast %563 : f32 to vector<16x128xf32>
    %573 = arith.select %61, %571, %572 : vector<16x128xi1>, vector<16x128xf32>
    %574 = vector.broadcast %570 : f32 to vector<16x128xf32>
    %575 = vector.broadcast %564 : f32 to vector<16x128xf32>
    %576 = arith.select %61, %574, %575 : vector<16x128xi1>, vector<16x128xf32>
    %577 = vector.broadcast %567 : f32 to vector<16x128xf32>
    %578 = vector.broadcast %565 : f32 to vector<16x128xf32>
    %579 = arith.select %61, %577, %578 : vector<16x128xi1>, vector<16x128xf32>
    %580 = vector.broadcast %568 : f32 to vector<16x128xf32>
    %581 = vector.broadcast %566 : f32 to vector<16x128xf32>
    %582 = arith.select %61, %580, %581 : vector<16x128xi1>, vector<16x128xf32>
    %c126_i32_103 = arith.constant 126 : i32
    %583 = tpu.dynamic_rotate %558 by %c126_i32_103 dim 1 : vector<16x128xf32>, i32 -> vector<16x128xf32>
    %c2_i32_104 = arith.constant 2 : i32
    %584 = tpu.dynamic_rotate %558 by %c2_i32_104 dim 1 : vector<16x128xf32>, i32 -> vector<16x128xf32>
    %585 = arith.select %61, %584, %583 : vector<16x128xi1>, vector<16x128xf32>
    %c126_i32_105 = arith.constant 126 : i32
    %586 = tpu.dynamic_rotate %562 by %c126_i32_105 dim 1 : vector<16x128xf32>, i32 -> vector<16x128xf32>
    %c2_i32_106 = arith.constant 2 : i32
    %587 = tpu.dynamic_rotate %562 by %c2_i32_106 dim 1 : vector<16x128xf32>, i32 -> vector<16x128xf32>
    %588 = arith.select %61, %587, %586 : vector<16x128xi1>, vector<16x128xf32>
    %589 = arith.mulf %573, %558 : vector<16x128xf32>
    %590 = arith.mulf %576, %562 : vector<16x128xf32>
    %591 = arith.subf %589, %590 : vector<16x128xf32>
    %592 = arith.mulf %579, %585 : vector<16x128xf32>
    %593 = arith.addf %591, %592 : vector<16x128xf32>
    %594 = arith.mulf %582, %588 : vector<16x128xf32>
    %595 = arith.subf %593, %594 : vector<16x128xf32>
    %596 = arith.mulf %573, %562 : vector<16x128xf32>
    %597 = arith.mulf %576, %558 : vector<16x128xf32>
    %598 = arith.addf %596, %597 : vector<16x128xf32>
    %599 = arith.mulf %579, %588 : vector<16x128xf32>
    %600 = arith.addf %598, %599 : vector<16x128xf32>
    %601 = arith.mulf %582, %585 : vector<16x128xf32>
    %602 = arith.addf %600, %601 : vector<16x128xf32>
    %c80 = arith.constant 80 : index
    %603 = memref.load %arg0[%c80] : memref<88xf32, #tpu.memory_space<smem>>
    %c81 = arith.constant 81 : index
    %604 = memref.load %arg0[%c81] : memref<88xf32, #tpu.memory_space<smem>>
    %c82 = arith.constant 82 : index
    %605 = memref.load %arg0[%c82] : memref<88xf32, #tpu.memory_space<smem>>
    %c83 = arith.constant 83 : index
    %606 = memref.load %arg0[%c83] : memref<88xf32, #tpu.memory_space<smem>>
    %c84 = arith.constant 84 : index
    %607 = memref.load %arg0[%c84] : memref<88xf32, #tpu.memory_space<smem>>
    %c85 = arith.constant 85 : index
    %608 = memref.load %arg0[%c85] : memref<88xf32, #tpu.memory_space<smem>>
    %c86 = arith.constant 86 : index
    %609 = memref.load %arg0[%c86] : memref<88xf32, #tpu.memory_space<smem>>
    %c87 = arith.constant 87 : index
    %610 = memref.load %arg0[%c87] : memref<88xf32, #tpu.memory_space<smem>>
    %611 = vector.broadcast %609 : f32 to vector<16x128xf32>
    %612 = vector.broadcast %603 : f32 to vector<16x128xf32>
    %613 = arith.select %67, %611, %612 : vector<16x128xi1>, vector<16x128xf32>
    %614 = vector.broadcast %610 : f32 to vector<16x128xf32>
    %615 = vector.broadcast %604 : f32 to vector<16x128xf32>
    %616 = arith.select %67, %614, %615 : vector<16x128xi1>, vector<16x128xf32>
    %617 = vector.broadcast %607 : f32 to vector<16x128xf32>
    %618 = vector.broadcast %605 : f32 to vector<16x128xf32>
    %619 = arith.select %67, %617, %618 : vector<16x128xi1>, vector<16x128xf32>
    %620 = vector.broadcast %608 : f32 to vector<16x128xf32>
    %621 = vector.broadcast %606 : f32 to vector<16x128xf32>
    %622 = arith.select %67, %620, %621 : vector<16x128xi1>, vector<16x128xf32>
    %c127_i32_107 = arith.constant 127 : i32
    %623 = tpu.dynamic_rotate %595 by %c127_i32_107 dim 1 : vector<16x128xf32>, i32 -> vector<16x128xf32>
    %c1_i32_108 = arith.constant 1 : i32
    %624 = tpu.dynamic_rotate %595 by %c1_i32_108 dim 1 : vector<16x128xf32>, i32 -> vector<16x128xf32>
    %625 = arith.select %67, %624, %623 : vector<16x128xi1>, vector<16x128xf32>
    %c127_i32_109 = arith.constant 127 : i32
    %626 = tpu.dynamic_rotate %602 by %c127_i32_109 dim 1 : vector<16x128xf32>, i32 -> vector<16x128xf32>
    %c1_i32_110 = arith.constant 1 : i32
    %627 = tpu.dynamic_rotate %602 by %c1_i32_110 dim 1 : vector<16x128xf32>, i32 -> vector<16x128xf32>
    %628 = arith.select %67, %627, %626 : vector<16x128xi1>, vector<16x128xf32>
    %629 = arith.mulf %613, %595 : vector<16x128xf32>
    %630 = arith.mulf %616, %602 : vector<16x128xf32>
    %631 = arith.subf %629, %630 : vector<16x128xf32>
    %632 = arith.mulf %619, %625 : vector<16x128xf32>
    %633 = arith.addf %631, %632 : vector<16x128xf32>
    %634 = arith.mulf %622, %628 : vector<16x128xf32>
    %635 = arith.subf %633, %634 : vector<16x128xf32>
    %636 = arith.mulf %613, %602 : vector<16x128xf32>
    %637 = arith.mulf %616, %595 : vector<16x128xf32>
    %638 = arith.addf %636, %637 : vector<16x128xf32>
    %639 = arith.mulf %619, %628 : vector<16x128xf32>
    %640 = arith.addf %638, %639 : vector<16x128xf32>
    %641 = arith.mulf %622, %625 : vector<16x128xf32>
    %642 = arith.addf %640, %641 : vector<16x128xf32>
    %643 = arith.mulf %635, %635 : vector<16x128xf32>
    %644 = arith.mulf %642, %642 : vector<16x128xf32>
    %645 = arith.addf %643, %644 : vector<16x128xf32>
    %c0_111 = arith.constant 0 : index
    %c0_112 = arith.constant 0 : index
    %646 = vector.load %arg1[%c0_111, %c0_112] : memref<16x128xf32, #tpu.memory_space<vmem>>, vector<16x128xf32>
    %cst_113 = arith.constant 1.000000e-30 : f32
    %647 = vector.broadcast %cst_113 : f32 to vector<16x128xf32>
    %648 = arith.maximumf %646, %647 : vector<16x128xf32>
    %649 = arith.divf %645, %648 : vector<16x128xf32>
    %c128_i32 = arith.constant 128 : i32
    %650 = vector.broadcast %c128_i32 : i32 to vector<16x128xi32>
    %651 = arith.muli %0, %650 : vector<16x128xi32>
    %652 = arith.addi %651, %1 : vector<16x128xi32>
    %653 = tpu.bitcast %649 : vector<16x128xf32> -> vector<16x128xi32>
    %c-2048_i32 = arith.constant -2048 : i32
    %654 = vector.broadcast %c-2048_i32 : i32 to vector<16x128xi32>
    %655 = arith.andi %653, %654 : vector<16x128xi32>
    %656 = arith.ori %655, %652 : vector<16x128xi32>
    %cst_114 = arith.constant dense<-2147483648> : vector<16xi32>
    %657 = vector.multi_reduction <maxsi>, %656, %cst_114 [1] : vector<16x128xi32> to vector<16xi32>
    %658 = vector.shape_cast %657 : vector<16xi32> to vector<16x1xi32>
    %cst_115 = arith.constant dense<-2147483648> : vector<1xi32>
    %659 = vector.multi_reduction <maxsi>, %658, %cst_115 [0] : vector<16x1xi32> to vector<1xi32>
    %660 = vector.shape_cast %659 : vector<1xi32> to vector<1x1xi32>
    %c2047_i32 = arith.constant 2047 : i32
    %661 = vector.broadcast %c2047_i32 : i32 to vector<1x1xi32>
    %662 = arith.andi %660, %661 : vector<1x1xi32>
    %c256_i32 = arith.constant 256 : i32
    %663 = vector.broadcast %c256_i32 : i32 to vector<1x1xi32>
    %664 = arith.andi %662, %663 : vector<1x1xi32>
    %c2_i32_116 = arith.constant 2 : i32
    %665 = vector.broadcast %c2_i32_116 : i32 to vector<1x1xi32>
    %666 = arith.shrsi %664, %665 : vector<1x1xi32>
    %c1024_i32 = arith.constant 1024 : i32
    %667 = vector.broadcast %c1024_i32 : i32 to vector<1x1xi32>
    %668 = arith.andi %662, %667 : vector<1x1xi32>
    %c1_i32_117 = arith.constant 1 : i32
    %669 = vector.broadcast %c1_i32_117 : i32 to vector<1x1xi32>
    %670 = arith.shrsi %668, %669 : vector<1x1xi32>
    %671 = arith.ori %666, %670 : vector<1x1xi32>
    %c191_i32 = arith.constant 191 : i32
    %672 = vector.broadcast %c191_i32 : i32 to vector<1x1xi32>
    %673 = arith.andi %662, %672 : vector<1x1xi32>
    %c0_i32_118 = arith.constant 0 : i32
    %674 = vector.broadcast %c0_i32_118 : i32 to vector<1x1xi32>
    %675 = arith.shli %673, %674 : vector<1x1xi32>
    %676 = arith.ori %671, %675 : vector<1x1xi32>
    %c512_i32 = arith.constant 512 : i32
    %677 = vector.broadcast %c512_i32 : i32 to vector<1x1xi32>
    %678 = arith.andi %662, %677 : vector<1x1xi32>
    %c1_i32_119 = arith.constant 1 : i32
    %679 = vector.broadcast %c1_i32_119 : i32 to vector<1x1xi32>
    %680 = arith.shli %678, %679 : vector<1x1xi32>
    %681 = arith.ori %676, %680 : vector<1x1xi32>
    %c64_i32_120 = arith.constant 64 : i32
    %682 = vector.broadcast %c64_i32_120 : i32 to vector<1x1xi32>
    %683 = arith.andi %662, %682 : vector<1x1xi32>
    %c2_i32_121 = arith.constant 2 : i32
    %684 = vector.broadcast %c2_i32_121 : i32 to vector<1x1xi32>
    %685 = arith.shli %683, %684 : vector<1x1xi32>
    %686 = arith.ori %681, %685 : vector<1x1xi32>
    %687 = tpu.iota {dimensions = array<i32: 1>} : vector<1x128xi32>
    %c10_i32 = arith.constant 10 : i32
    %688 = vector.broadcast %c10_i32 : i32 to vector<1x128xi32>
    %689 = arith.subi %688, %687 : vector<1x128xi32>
    %c0_i32_122 = arith.constant 0 : i32
    %690 = vector.broadcast %c0_i32_122 : i32 to vector<1x128xi32>
    %691 = arith.maxsi %689, %690 : vector<1x128xi32>
    %692 = vector.shape_cast %686 : vector<1x1xi32> to vector<1x1xi32>
    %693 = vector.broadcast %692 : vector<1x1xi32> to vector<1x128xi32>
    %694 = arith.shrui %693, %691 : vector<1x128xi32>
    %c1_i32_123 = arith.constant 1 : i32
    %695 = vector.broadcast %c1_i32_123 : i32 to vector<1x128xi32>
    %696 = arith.andi %694, %695 : vector<1x128xi32>
    %c11_i32 = arith.constant 11 : i32
    %697 = vector.broadcast %c11_i32 : i32 to vector<1x128xi32>
    %698 = arith.cmpi slt, %687, %697 : vector<1x128xi32>
    %c0_i32_124 = arith.constant 0 : i32
    %699 = vector.broadcast %c0_i32_124 : i32 to vector<1x128xi32>
    %700 = arith.select %698, %696, %699 : vector<1x128xi1>, vector<1x128xi32>
    %c0_125 = arith.constant 0 : index
    %c0_126 = arith.constant 0 : index
    %701 = vector.load %arg2[%c0_125, %c0_126] : memref<1x128xi32, #tpu.memory_space<vmem>>, vector<1x128xi32>
    tpu.vector_store %arg2[%c0_125, %c0_126], %700 {strides = array<i32>} : memref<1x128xi32, #tpu.memory_space<vmem>>, vector<1x128xi32>,
    return
  }
}

</mosaic_0001>

<bundles_post_ra>
// kernel: quantum_torch_model_forward.1
= control target key start
LH: loop header
LB: loop body
LE: loop exit
PB: predicated region body
PF: predicated region fallthrough
CT: control target
= control target key end

     0   :  { %7 = vsyncpa [#allocation3], 0  ;;  %s2325_s0 = inlined_call_operand.vmem [shape: f32[88], index: 0, kind: input, shape index: {}]   ;;  %s2326_s1 = inlined_call_operand.vmem [shape: f32[16,128], index: 1, kind: input, shape index: {}]   ;;  %s2327_s2 = inlined_call_operand.vmem [shape: s32[1,128], index: 2, kind: output, shape index: {}]  }
   0x1   :  { %s14_s11 = sshll.u32 %s2325_s0, 4  ;;  %s15_s11 = int_to_ptr.vmem [resolvable:$true] %s14_s11 }
   0x2   :  { %s1301_s12 = scalar_lea.vmem %s15_s11, 16  ;;  %p1306_p1 = scmp.lt.s32.totalorder %s15_s11, %s15_s11 }
   0x3   :  { %p1302_p0 = scmp.ne.s32.totalorder %s15_s11, %s1301_s12  ;;  %p1307_p2 = scmp.lt.s32.totalorder %s1301_s12, %s1301_s12 }
   0x5   :  { %p1308_p3 = por %p1307_p2, %p1306_p1 }
   0x7   :  { %p1309_p4 = pnand %p1308_p3, %p1302_p0 }
   0x9   :  { %1312 = shalt.err (!%p1309_p4)
}
   0xa   :  { %s1315_s13 = smov [#allocation2]  }
   0xb   :  { %17 = dma.vmem_to_smem %s15_s11, 16, %s1315_s13, [#allocation3]  }
   0xc   :  { %1313 = dma.done.wait [#allocation3], 16  }
   0xd   :  { %1314 = vsyncadd [#allocation3], 4294967280 }
   0xe   :  { %23 = sfence }
   0xf   :  { %v24_v0 = vlaneseq  ;;  %v1316_v3 = vmov 0.0   ;;  %s1317_s0 = smov 64   ;;  %s1394_s14 = sld [smem:[#allocation2]] }
  0x10   :  { %1293 = vrot.lane.b32.xlu1 %v1316_v3, %s1317_s0  ;;  %v79_v9 = vrot.slane %v1316_v3, 4  ;;  %s1396_s15 = sld [smem:[#allocation2 + $0x1]]  ;;  %s1398_s16 = sld [smem:[#allocation2 + $0x6]] }
  0x11   :  { %v1348_v1 = vshrl.u32 %v24_v0, 7  ;;  %v1350_v2 = vand.u32 127, %v24_v0  ;;  %s1400_s17 = sld [smem:[#allocation2 + $0x7]]  ;;  %s1402_s18 = sld [smem:[#allocation2 + $0x2]] }
  0x12   :  { %s1404_s19 = sld [smem:[#allocation2 + $0x4]]  ;;  %s1406_s20 = sld [smem:[#allocation2 + $0x3]] }
  0x13   :  { %v1354_v4 = vadd.s32 8, %v1348_v1  ;;  %v29_v5 = vshra.s32 %v1348_v1, 2  ;;  %vm71_vm0 = vcmp.eq.s32.totalorder %v1348_v1, 0  ;;  %vm73_vm1 = vcmp.eq.s32.totalorder %v1350_v2, 0  ;;  %s1408_s21 = sld [smem:[#allocation2 + $0x5]]  ;;  %s1413_s22 = sld [smem:[#allocation2 + $0xa]] }
  0x14   :  { %vm74_vm2 = vmand %vm71_vm0, %vm73_vm1  ;;  %vm80_vm3 = vcmp.lt.s32.totalorder %v1348_v1, 4  ;;  %v35_v12 = vshra.s32 %v1348_v1, 3  ;;  %v41_v35 = vshra.s32 %v1350_v2, 6  ;;  %s1415_s23 = sld [smem:[#allocation2 + $0xc]]  ;;  %s1417_s24 = sld [smem:[#allocation2 + $0x8]] }
  0x15   :  { %v30_v6 = vshra.s32 %v1354_v4, 2  ;;  %v1360_v7 = vand.u32 1, %v29_v5  ;;  %v76_v8 = vsel %vm74_vm2, 1.0, %v1316_v3  ;;  %v36_v13 = vshra.s32 %v1354_v4, 3  ;;  %s1423_s25 = sld [smem:[#allocation2 + $0x9]]  ;;  %s1427_s26 = sld [smem:[#allocation2 + $0xb]] }
  0x16   :  { %v78_v11 = vrot.slane %v76_v8, 4  ;;  %v1377_v20 = vand.u32 1, %v35_v12  ;;  %v1411_v38 = vand.u32 1, %v41_v35  ;;  %v144_v39 = vstv %s1398_s16  ;;  %s1429_s27 = sld [smem:[#allocation2 + $0xe]]  ;;  %s1446_s28 = sld [smem:[#allocation2 + $0xd]] }
  0x17   :  { %v1362_v10 = vand.u32 1, %v30_v6  ;;  %vm33_vm4 = vcmp.eq.s32.totalorder %v1360_v7, 1  ;;  %v1379_v21 = vand.u32 1, %v36_v13  ;;  %v145_v40 = vstv %s1394_s14  ;;  %s1448_s29 = sld [smem:[#allocation2 + $0xf]]  ;;  %s1458_s30 = sld [smem:[#allocation2 + $0x10]] }
  0x18   :  { %v81_v14 = vsel %vm80_vm3, %v78_v11, %v79_v9  ;;  %v82_v15 = vsel %vm80_vm3, %v79_v9, %v78_v11  ;;  %vm39_vm6 = vcmp.eq.s32.totalorder %v1377_v20, 1  ;;  %v148_v41 = vstv %s1400_s17  ;;  %s1460_s3 = sld [smem:[#allocation2 + $0x11]]  ;;  %s1482_s4 = sld [smem:[#allocation2 + $0x16]] }
  0x19   :  { %vm34_vm5 = vcmp.eq.s32.totalorder %v1362_v10, 1  ;;  %v83_v16 = vsel %vm33_vm4, %v82_v15, %v81_v14  ;;  %vm40_vm7 = vcmp.eq.s32.totalorder %v1379_v21, 1  ;;  %v149_v42 = vstv %s1396_s15  ;;  %s1484_s5 = sld [smem:[#allocation2 + $0x17]]  ;;  %s1207_s6 = sld [smem:[#allocation2 + $0x12]]  ;;  %vm1588_vm11 = vmand %vm33_vm4, %vm39_vm6 }
  0x1a   :  { %v84_v17 = vsel %vm34_vm5, %v81_v14, %v82_v15  ;;  %v85_v18 = vsub.f32 %v83_v16, %v76_v8  ;;  %v87_v19 = vadd.f32 %v83_v16, %v76_v8  ;;  %v152_v43 = vstv %s1404_s19  ;;  %s1209_s7 = sld [smem:[#allocation2 + $0x14]]  ;;  %s1534_s8 = sld [smem:[#allocation2 + $0x13]]  ;;  %vm1564_vm9 = vmand %vm34_vm5, %vm40_vm7 }
  0x1b   :  { %v92_v22 = vmul.f32 0.70710677, %v84_v17  ;;  %v153_v44 = vstv %s1402_s18  ;;  %v156_v47 = vstv %s1408_s21  ;;  %v157_v48 = vstv %s1406_s20  ;;  %s1536_s9 = sld [smem:[#allocation2 + $0x15]]  ;;  %s1538_s10 = sld [smem:[#allocation2 + $0x18]] }
  0x1c   :  { %v89_v23 = vsel %vm33_vm4, %v85_v18, %v87_v19  ;;  %vm43_vm8 = vcmp.eq.s32.totalorder %v1411_v38, 1  ;;  %v146_v50 = vsel %vm33_vm4, %v144_v39, %v145_v40  ;;  %v147_v51 = vsel %vm34_vm5, %v144_v39, %v145_v40  ;;  %s1540_s11 = sld [smem:[#allocation2 + $0x1a]]  ;;  %s1542_s12 = sld [smem:[#allocation2 + $0x1c]] }
  0x1d   :  { %v91_v24 = vmul.f32 0.70710677, %v89_v23  ;;  %v150_v54 = vsel %vm33_vm4, %v148_v41, %v149_v42  ;;  %v151_v55 = vsel %vm34_vm5, %v148_v41, %v149_v42  ;;  %v154_v56 = vsel %vm33_vm4, %v152_v43, %v153_v44  ;;  %s1544_s13 = sld [smem:[#allocation2 + $0x1e]]  ;;  %s1547_s14 = sld [smem:[#allocation2 + $0x19]]  ;;  %vm1580_vm10 = vmand %vm40_vm7, %vm43_vm8 }
  0x1e   :  { %v155_v57 = vsel %vm34_vm5, %v152_v43, %v153_v44  ;;  %v158_v58 = vsel %vm33_vm4, %v156_v47, %v157_v48  ;;  %v159_v62 = vsel %vm34_vm5, %v156_v47, %v157_v48  ;;  %v216_v3 = vstv %s1415_s23  ;;  %s1549_s15 = sld [smem:[#allocation2 + $0x1b]]  ;;  %s1551_s16 = sld [smem:[#allocation2 + $0x1d]]  ;;  %vm1605_vm14 = vmand %vm39_vm6, %vm43_vm8 }
  0x1f   :  { %v98_v25 = vsub.f32 %v92_v22, %v91_v24  ;;  %v100_v26 = vadd.f32 %v92_v22, %v91_v24  ;;  %v99_v27 = vsub.f32 %v91_v24, %v92_v22  ;;  %v217_v5 = vstv %s1413_s22  ;;  %s1553_s17 = sld [smem:[#allocation2 + $0x1f]]  ;;  %s1570_s18 = sld [smem:[#allocation2 + $0x20]]  ;;  %vm313_vm15 = vmxor %vm1564_vm9, %vm1580_vm10 }
  0x20   :  { %v209_v11 = vstv %s1417_s24  ;;  %v213_v15 = vstv %s1423_s25  ;;  %v208_v17 = vstv %s1429_s27  ;;  %v1479_v18 = vsel %vm40_vm7, %v216_v3, %v217_v5  ;;  %s1572_s19 = sld [smem:[#allocation2 + $0x26]]  ;;  %s1622_s20 = sld [smem:[#allocation2 + $0x21]]  ;;  %vm1630_vm1 = vmand %vm43_vm8, %vm34_vm5 }
  0x21   :  { %v101_v28 = vsel %vm39_vm6, %v98_v25, %v100_v26  ;;  %v102_v29 = vsel %vm40_vm7, %v99_v27, %v100_v26  ;;  %v221_v19 = vstv %s1427_s26  ;;  %v220_v35 = vstv %s1446_s28  ;;  %s1624_s21 = sld [smem:[#allocation2 + $0x27]]  ;;  %s1663_s22 = sld [smem:[#allocation2 + $0x22]] }
  0x22   :  { %v103_v30 = vmul.f32 0.70710677, %v101_v28  ;;  %v1390_v31 = vmul.f32 0.70710677, %v102_v29  ;;  %v261_v39 = vstv %s1458_s30  ;;  %v264_v40 = vstv %s1460_s3  ;;  %s1707_s23 = sld [smem:[#allocation2 + $0x23]]  ;;  %s1709_s24 = sld [smem:[#allocation2 + $0x24]] }
  0x23   :  { %v391_v20 = vstv %s1547_s14  ;;  %vm328_vm2 = vcmp.lt.s32.totalorder %v1348_v1, 7  ;;  %vm359_vm10 = vcmp.lt.s32.totalorder %v1348_v1, 2  ;;  %s1783_s25 = sld [smem:[#allocation2 + $0x25]]  ;;  %s1318_s26 = smov 96   ;;  %v57_v21 = vshra.s32 %v1350_v2, 4 }
  0x24   :  { %112 = vrot.lane.b32.xlu0 %v103_v30, %s1317_s0  ;;  %s1319_s27 = smov 32   ;;  %s1320_s28 = smov 120  }
  0x25   :  { %s1322_s30 = smov 112   ;;  %s1323_s3 = smov 16  }
  0x26   :  { %s1237_s14 = sld [smem:[#allocation2 + $0x30]] }
  0x28   :  { %114 = vrot.lane.b32.xlu0 %v1390_v31, %s1317_s0 }
  0x82   :  { %v1294_v32 = vpop.permute.xlu1 %1293 }
  0x83   :  { %v1296_v33 = vunpack.i.h.bf16 %v1294_v32  ;;  %v1295_v34 = vunpack.i.l.bf16 %v1294_v32 }
  0x85   :  { %v135_v36 = vmul.f32 0.70710677, %v1296_v33  ;;  %v134_v37 = vmul.f32 0.70710677, %v1295_v34  ;;  %v212_v34 = vstv %s1448_s29  ;;  %s1321_s29 = smov 8  }
  0x87   :  { %v167_v45 = vrot.slane %v135_v36, 4  ;;  %v166_v46 = vrot.slane %v134_v37, 4  ;;  %v186_v6 = vmul.f32 %v146_v50, %v134_v37  ;;  %v174_v22 = vmul.f32 %v150_v54, %v134_v37 }
  0x88   :  { %v187_v23 = vmul.f32 %v147_v51, %v135_v36  ;;  %v175_v26 = vmul.f32 %v151_v55, %v135_v36 }
  0x89   :  { %v168_v59 = vsel %vm80_vm3, %v166_v46, %v167_v45  ;;  %v169_v60 = vsel %vm80_vm3, %v167_v45, %v166_v46 }
  0x8a   :  { %v170_v12 = vsel %vm33_vm4, %v169_v60, %v168_v59  ;;  %v171_v13 = vsel %vm34_vm5, %v168_v59, %v169_v60 }
  0x8b   :  { %v192_v27 = vmul.f32 %v170_v12, %v154_v56  ;;  %v193_v28 = vmul.f32 %v171_v13, %v155_v57 }
  0x96   :  { %v113_v49 = vpop.permute.xlu0 %112 }
  0x97   :  { %v120_v52 = vsub.f32 %v113_v49, %v103_v30  ;;  %v122_v53 = vadd.f32 %v113_v49, %v103_v30 }
  0x99   :  { %v124_v61 = vsel %vm43_vm8, %v120_v52, %v122_v53  ;;  %v260_v53 = vstv %s1482_s4  ;;  %s1324_s4 = smov 124  }
  0x9a   :  { %v126_v63 = vmul.f32 0.70710677, %v124_v61  ;;  %v115_v0 = vpop.permute.xlu0 %114 }
  0x9b   :  { %v121_v8 = vsub.f32 %v115_v0, %v1390_v31  ;;  %v123_v9 = vadd.f32 %v115_v0, %v1390_v31  ;;  %v215_v0 = vsel %vm40_vm7, %v212_v34, %v213_v15 }
  0x9c   :  { %v188_v14 = vmul.f32 %v150_v54, %v126_v63  ;;  %v172_v24 = vmul.f32 %v146_v50, %v126_v63  ;;  %v160_v30 = vrot.slane %v126_v63, 4  ;;  %v263_v54 = vstv %s1484_s5  ;;  %s1325_s5 = smov 4  }
  0x9d   :  { %v125_v16 = vsel %vm43_vm8, %v121_v8, %v123_v9  ;;  %v223_v9 = vsel %vm40_vm7, %v220_v35, %v221_v19 }
  0x9e   :  { %v127_v25 = vmul.f32 0.70710677, %v125_v16  ;;  %v190_v29 = vadd.f32 %v188_v14, %v186_v6  ;;  %v176_v41 = vsub.f32 %v172_v24, %v174_v22  ;;  %v214_v6 = vsel %vm39_vm6, %v212_v34, %v213_v15 }
  0xa0   :  { %v161_v31 = vrot.slane %v127_v25, 4  ;;  %v173_v32 = vmul.f32 %v147_v51, %v127_v25  ;;  %v189_v33 = vmul.f32 %v151_v55, %v127_v25  ;;  %v194_v46 = vadd.f32 %v192_v27, %v190_v29 }
  0xa1   :  { %v182_v51 = vmul.f32 %v170_v12, %v158_v58  ;;  %v183_v55 = vmul.f32 %v171_v13, %v159_v62  ;;  %v262_v12 = vsel %vm43_vm8, %v260_v53, %v261_v39  ;;  %v265_v13 = vsel %vm43_vm8, %v263_v54, %v264_v40 }
  0xa2   :  { %v162_v37 = vsel %vm80_vm3, %v160_v30, %v161_v31  ;;  %v163_v36 = vsel %vm80_vm3, %v161_v31, %v160_v30  ;;  %v191_v42 = vadd.f32 %v189_v33, %v187_v23  ;;  %v177_v44 = vsub.f32 %v173_v32, %v175_v26  ;;  %vm312_vm3 = vmxor %vm1588_vm11, %vm1605_vm14 }
  0xa3   :  { %v165_v43 = vsel %vm34_vm5, %v162_v37, %v163_v36  ;;  %v164_v45 = vsel %vm33_vm4, %v163_v36, %v162_v37  ;;  %vm333_vm5 = vcmp.lt.s32.totalorder %v1348_v1, 1 }
  0xa4   :  { %v179_v47 = vmul.f32 %v165_v43, %v155_v57  ;;  %v195_v48 = vadd.f32 %v193_v28, %v191_v42  ;;  %v178_v49 = vmul.f32 %v164_v45, %v154_v56  ;;  %v196_v50 = vmul.f32 %v164_v45, %v158_v58 }
  0xa5   :  { %v197_v52 = vmul.f32 %v165_v43, %v159_v62  ;;  %v218_v57 = vsel %vm39_vm6, %v216_v3, %v217_v5  ;;  %v211_v58 = vsel %vm40_vm7, %v208_v17, %v209_v11  ;;  %v210_v62 = vsel %vm39_vm6, %v208_v17, %v209_v11  ;;  %vm1674_vm7 = vmxor %vm313_vm15, %vm1630_vm1 }
  0xa6   :  { %v181_v59 = vadd.f32 %v179_v47, %v177_v44  ;;  %v180_v60 = vadd.f32 %v178_v49, %v176_v41  ;;  %v198_v61 = vadd.f32 %v196_v50, %v194_v46  ;;  %v222_v3 = vsel %vm39_vm6, %v220_v35, %v221_v19  ;;  %vm1659_vm6 = vmand %vm43_vm8, %vm33_vm4 }
  0xa7   :  { %v199_v63 = vadd.f32 %v197_v52, %v195_v48  ;;  %vm1687_vm4 = vmxor %vm312_vm3, %vm1659_vm6 }
  0xa8   :  { %v184_v56 = vsub.f32 %v180_v60, %v182_v51  ;;  %v185_v8 = vsub.f32 %v181_v59, %v183_v55  ;;  %v226_v16 = vmul.f32 %v214_v6, %v198_v61  ;;  %v238_v24 = vmul.f32 %v210_v62, %v198_v61 }
  0xa9   :  { %v227_v14 = vmul.f32 %v215_v0, %v199_v63  ;;  %v239_v22 = vmul.f32 %v211_v58, %v199_v63  ;;  %v245_v29 = vmul.f32 %v1479_v18, %v198_v61  ;;  %v244_v31 = vmul.f32 %v218_v57, %v199_v63 }
  0xaa   :  { %v225_v5 = vmul.f32 %v211_v58, %v185_v8  ;;  %v224_v15 = vmul.f32 %v210_v62, %v184_v56  ;;  %v241_v23 = vmul.f32 %v215_v0, %v185_v8  ;;  %v240_v11 = vmul.f32 %v214_v6, %v184_v56 }
  0xab   :  { %v231_v25 = vmul.f32 %v1479_v18, %v184_v56  ;;  %v230_v27 = vmul.f32 %v218_v57, %v185_v8  ;;  %v235_v19 = vmul.f32 %v223_v9, %v198_v61  ;;  %v234_v34 = vmul.f32 %v222_v3, %v199_v63 }
  0xac   :  { %v229_v17 = vsub.f32 %v225_v5, %v227_v14  ;;  %v228_v26 = vsub.f32 %v224_v15, %v226_v16  ;;  %v243_v28 = vadd.f32 %v241_v23, %v239_v22  ;;  %v242_v30 = vadd.f32 %v240_v11, %v238_v24 }
  0xad   :  { %v249_v39 = vmul.f32 %v223_v9, %v184_v56  ;;  %v248_v41 = vmul.f32 %v222_v3, %v185_v8  ;;  %v49_v55 = vshra.s32 %v1354_v4, 1  ;;  %v266_v59 = vstv %s1209_s7  ;;  %s1230_s7 = sld [smem:[#allocation2 + $0x29]] }
  0xae   :  { %v233_v32 = vadd.f32 %v231_v25, %v229_v17  ;;  %v232_v33 = vadd.f32 %v230_v27, %v228_v26  ;;  %v247_v35 = vadd.f32 %v245_v29, %v243_v28  ;;  %v246_v40 = vadd.f32 %v244_v31, %v242_v30 }
  0xaf   :  { %v267_v60 = vstv %s1207_s6  ;;  %v45_v61 = vand.u32 1, %v1354_v4  ;;  %v1556_v63 = vand.u32 1, %v49_v55  ;;  %v44_v57 = vand.u32 1, %v1348_v1  ;;  %s1229_s6 = sld [smem:[#allocation2 + $0x28]] }
  0xb0   :  { %v237_v37 = vsub.f32 %v233_v32, %v235_v19  ;;  %v236_v36 = vsub.f32 %v232_v33, %v234_v34  ;;  %v251_v42 = vadd.f32 %v249_v39, %v247_v35  ;;  %v250_v43 = vadd.f32 %v248_v41, %v246_v40 }
  0xb1   :  { %v268_v0 = vsel %vm43_vm8, %v266_v59, %v267_v60  ;;  %v48_v56 = vshra.s32 %v1348_v1, 1  ;;  %v269_v8 = vstv %s1536_s9  ;;  %v270_v58 = vstv %s1534_s8  ;;  %s1235_s8 = sld [smem:[#allocation2 + $0x2e]]  ;;  %s1236_s9 = sld [smem:[#allocation2 + $0x2f]] }
  0xb2   :  { %274 = vrot.lane.b32.xlu0 %v237_v37, %s1317_s0  ;;  %v1521_v44 = vmul.f32 %v262_v12, %v237_v37  ;;  %v297_v45 = vmul.f32 %v265_v13, %v237_v37  ;;  %272 = vrot.lane.b32.xlu1 %v236_v36, %s1317_s0  ;;  %v1524_v18 = vmul.f32 %v262_v12, %v236_v36  ;;  %v386_v3 = vstv %s1544_s13  ;;  %s1234_s13 = sld [smem:[#allocation2 + $0x2d]] }
  0xb3   :  { %v296_v46 = vmul.f32 %v265_v13, %v236_v36  ;;  %v283_v47 = vmul.f32 %v265_v13, %v251_v42  ;;  %v295_v48 = vmul.f32 %v262_v12, %v251_v42  ;;  %v282_v49 = vmul.f32 %v265_v13, %v250_v43 }
  0xb4   :  { %v294_v50 = vmul.f32 %v262_v12, %v250_v43  ;;  %v387_v5 = vstv %s1538_s10  ;;  %v394_v14 = vstv %s1542_s12  ;;  %v395_v15 = vstv %s1540_s11  ;;  %s1231_s10 = sld [smem:[#allocation2 + $0x2a]]  ;;  %s1233_s11 = sld [smem:[#allocation2 + $0x2c]] }
  0xb5   :  { %v285_v51 = vsub.f32 %v1521_v44, %v283_v47  ;;  %v284_v52 = vsub.f32 %v1524_v18, %v282_v49  ;;  %v1528_v53 = vadd.f32 %v297_v45, %v295_v48  ;;  %vm1596_vm12 = vcmp.eq.s32.totalorder %v45_v61, 1  ;;  %s1232_s12 = sld [smem:[#allocation2 + $0x2b]] }
  0xb6   :  { %278 = vrot.lane.b32.xlu0 %v251_v42, %s1317_s0  ;;  %276 = vrot.lane.b32.xlu1 %v250_v43, %s1317_s0  ;;  %v1532_v54 = vadd.f32 %v296_v46, %v294_v50  ;;  %vm53_vm13 = vcmp.eq.s32.totalorder %v1556_v63, 1  ;;  %v271_v24 = vsel %vm43_vm8, %v269_v8, %v270_v58  ;;  %vm1615_vm0 = vcmp.eq.s32.totalorder %v44_v57, 1 }
  0xb7   :  { %v1619_v17 = vand.u32 1, %v48_v56  ;;  %v1637_v26 = vsel %vm1615_vm0, %v386_v3, %v387_v5  ;;  %v1641_v27 = vsel %vm1615_vm0, %v394_v14, %v395_v15  ;;  %v398_v28 = vstv %s1551_s16  ;;  %vm1918_vm15 = vmand %vm1596_vm12, %vm53_vm13  ;;  %s2086_s16 = sld [smem:[#allocation2 + $0x31]] }
  0xb8   :  { %v399_v29 = vstv %s1549_s15  ;;  %v1652_v32 = vsel %vm1596_vm12, %v386_v3, %v387_v5  ;;  %v390_v19 = vstv %s1553_s17  ;;  %v458_v42 = vstv %s1572_s19  ;;  %s1243_s15 = sld [smem:[#allocation2 + $0x36]]  ;;  %s1244_s17 = sld [smem:[#allocation2 + $0x37]] }
  0xb9   :  { %v459_v43 = vstv %s1570_s18  ;;  %v1693_v47 = vsel %vm1615_vm0, %v390_v19, %v391_v20  ;;  %v1697_v48 = vsel %vm1596_vm12, %v390_v19, %v391_v20  ;;  %v1701_v49 = vsel %vm1615_vm0, %v398_v28, %v399_v29  ;;  %s1239_s18 = sld [smem:[#allocation2 + $0x32]]  ;;  %s1241_s19 = sld [smem:[#allocation2 + $0x34]] }
  0xba   :  { %v1705_v50 = vsel %vm1596_vm12, %v394_v14, %v395_v15  ;;  %vm354_vm8 = vcmp.lt.s32.totalorder %v1348_v1, 6  ;;  %v1715_v55 = vsel %vm1596_vm12, %v398_v28, %v399_v29  ;;  %v1723_v59 = vsel %vm53_vm13, %v458_v42, %v459_v43 }
  0xbb   :  { %v462_v60 = vstv %s1624_s21  ;;  %v463_v61 = vstv %s1622_s20  ;;  %vm52_vm14 = vcmp.eq.s32.totalorder %v1619_v17, 1  ;;  %v467_v15 = vstv %s1663_s22  ;;  %s1240_s20 = sld [smem:[#allocation2 + $0x33]]  ;;  %s1242_s21 = sld [smem:[#allocation2 + $0x35]] }
  0xbc   :  { %v1742_v14 = vsel %vm53_vm13, %v462_v60, %v463_v61  ;;  %v466_v19 = vstv %s1709_s24  ;;  %s1245_s22 = sld [smem:[#allocation2 + $0x38]]  ;;  %s2113_s24 = sld [smem:[#allocation2 + $0x39]] }
 0x124   :  { %v275_v9 = vpop.permute.xlu0 %274  ;;  %v273_v12 = vpop.permute.xlu1 %272 }
 0x125   :  { %v287_v16 = vmul.f32 %v275_v9, %v268_v0  ;;  %v286_v22 = vmul.f32 %v273_v12, %v268_v0  ;;  %v305_v37 = vmul.f32 %v275_v9, %v271_v24  ;;  %v304_v36 = vmul.f32 %v273_v12, %v271_v24 }
 0x127   :  { %v289_v30 = vadd.f32 %v287_v16, %v285_v51  ;;  %v288_v10 = vadd.f32 %v286_v22, %v284_v52 }
 0x128   :  { %v279_v31 = vpop.permute.xlu0 %278  ;;  %v277_v33 = vpop.permute.xlu1 %276 }
 0x129   :  { %v291_v34 = vmul.f32 %v279_v31, %v271_v24  ;;  %v301_v35 = vmul.f32 %v279_v31, %v268_v0  ;;  %v290_v40 = vmul.f32 %v277_v33, %v271_v24  ;;  %v300_v41 = vmul.f32 %v277_v33, %v268_v0 }
 0x12a   :  { %v471_v33 = vstv %s1707_s23  ;;  %s1251_s23 = sld [smem:[#allocation2 + $0x3e]] }
 0x12b   :  { %v293_v38 = vsub.f32 %v289_v30, %v291_v34  ;;  %v303_v44 = vadd.f32 %v301_v35, %v1528_v53  ;;  %v292_v45 = vsub.f32 %v288_v10, %v290_v40  ;;  %v302_v18 = vadd.f32 %v300_v41, %v1532_v54 }
 0x12d   :  { %v307_v51 = vadd.f32 %v305_v37, %v303_v44  ;;  %v319_v52 = vsub.f32 0.0, %v293_v38  ;;  %v306_v53 = vadd.f32 %v304_v36, %v302_v18  ;;  %v318_v54 = vsub.f32 0.0, %v292_v45 }
 0x12f   :  { %v321_v0 = vsel %vm1674_vm7, %v319_v52, %v293_v38  ;;  %v323_v57 = vsub.f32 0.0, %v307_v51  ;;  %v320_v56 = vsel %vm1687_vm4, %v318_v54, %v292_v45  ;;  %v322_v8 = vsub.f32 0.0, %v306_v53 }
 0x130   :  { %v327_v58 = vrot.slane %v321_v0, 1  ;;  %v332_v62 = vrot.slane %v321_v0, 7  ;;  %v326_v9 = vrot.slane %v320_v56, 1  ;;  %v331_v12 = vrot.slane %v320_v56, 7 }
 0x131   :  { %v325_v3 = vsel %vm1674_vm7, %v323_v57, %v307_v51  ;;  %v324_v5 = vsel %vm1687_vm4, %v322_v8, %v306_v53 }
 0x132   :  { %v341_v16 = vrot.slane %v325_v3, 1  ;;  %v345_v22 = vrot.slane %v325_v3, 7  ;;  %v329_v23 = vsel %vm328_vm2, %v326_v9, %v327_v58  ;;  %v330_v24 = vsel %vm328_vm2, %v327_v58, %v326_v9 }
 0x133   :  { %v334_v20 = vsel %vm333_vm5, %v331_v12, %v332_v62  ;;  %v335_v28 = vsel %vm333_vm5, %v332_v62, %v331_v12  ;;  %v340_v29 = vrot.slane %v324_v5, 1  ;;  %v344_v30 = vrot.slane %v324_v5, 7 }
 0x134   :  { %v336_v10 = vsel %vm1615_vm0, %v335_v28, %v329_v23  ;;  %v337_v31 = vsel %vm1596_vm12, %v334_v20, %v330_v24 }
 0x135   :  { %v338_v34 = vsel %vm1588_vm11, %v336_v10, %v320_v56  ;;  %v339_v35 = vsel %vm1564_vm9, %v337_v31, %v321_v0  ;;  %v342_v40 = vsel %vm328_vm2, %v340_v29, %v341_v16  ;;  %v343_v41 = vsel %vm328_vm2, %v341_v16, %v340_v29 }
 0x136   :  { %v346_v37 = vsel %vm333_vm5, %v344_v30, %v345_v22  ;;  %v347_v36 = vsel %vm333_vm5, %v345_v22, %v344_v30  ;;  %v352_v7 = vrot.slane %v338_v34, 2  ;;  %v353_v38 = vrot.slane %v339_v35, 2 }
 0x137   :  { %v348_v44 = vsel %vm1615_vm0, %v347_v36, %v342_v40  ;;  %v349_v45 = vsel %vm1596_vm12, %v346_v37, %v343_v41  ;;  %v357_v18 = vrot.slane %v338_v34, 6  ;;  %v358_v46 = vrot.slane %v339_v35, 6 }
 0x138   :  { %v350_v51 = vsel %vm1588_vm11, %v348_v44, %v324_v5  ;;  %v351_v52 = vsel %vm1564_vm9, %v349_v45, %v325_v3  ;;  %v355_v53 = vsel %vm354_vm8, %v352_v7, %v353_v38  ;;  %v356_v54 = vsel %vm354_vm8, %v353_v38, %v352_v7 }
 0x139   :  { %v360_v0 = vsel %vm359_vm10, %v357_v18, %v358_v46  ;;  %v361_v57 = vsel %vm359_vm10, %v358_v46, %v357_v18  ;;  %v366_v56 = vrot.slane %v350_v51, 2  ;;  %v367_v8 = vrot.slane %v351_v52, 2 }
 0x13a   :  { %v362_v58 = vsel %vm52_vm14, %v361_v57, %v355_v53  ;;  %v363_v62 = vsel %vm53_vm13, %v360_v0, %v356_v54  ;;  %v370_v9 = vrot.slane %v350_v51, 6  ;;  %v371_v12 = vrot.slane %v351_v52, 6 }
 0x13b   :  { %v364_v3 = vsel %vm1659_vm6, %v362_v58, %v338_v34  ;;  %v365_v5 = vsel %vm1630_vm1, %v363_v62, %v339_v35  ;;  %v368_v16 = vsel %vm354_vm8, %v366_v56, %v367_v8  ;;  %v369_v22 = vsel %vm354_vm8, %v367_v8, %v366_v56 }
 0x13c   :  { %v372_v23 = vsel %vm359_vm10, %v370_v9, %v371_v12  ;;  %v373_v24 = vsel %vm359_vm10, %v371_v12, %v370_v9  ;;  %v402_v20 = vrot.slane %v364_v3, 1  ;;  %v403_v28 = vrot.slane %v365_v5, 1 }
 0x13d   :  { %v374_v29 = vsel %vm52_vm14, %v373_v24, %v368_v16  ;;  %v375_v30 = vsel %vm53_vm13, %v372_v23, %v369_v22  ;;  %v406_v10 = vrot.slane %v364_v3, 7  ;;  %v407_v31 = vrot.slane %v365_v5, 7 }
 0x13e   :  { %v376_v34 = vsel %vm1659_vm6, %v374_v29, %v350_v51  ;;  %v377_v35 = vsel %vm1630_vm1, %v375_v30, %v351_v52  ;;  %v404_v40 = vsel %vm328_vm2, %v402_v20, %v403_v28  ;;  %v405_v41 = vsel %vm328_vm2, %v403_v28, %v402_v20 }
 0x13f   :  { %v408_v37 = vsel %vm333_vm5, %v406_v10, %v407_v31  ;;  %v409_v36 = vsel %vm333_vm5, %v407_v31, %v406_v10  ;;  %v412_v7 = vrot.slane %v376_v34, 1  ;;  %v413_v38 = vrot.slane %v377_v35, 1 }
 0x140   :  { %v410_v44 = vsel %vm1615_vm0, %v409_v36, %v404_v40  ;;  %v416_v45 = vrot.slane %v376_v34, 7  ;;  %v417_v18 = vrot.slane %v377_v35, 7  ;;  %v470_v46 = vstv %s1783_s25  ;;  %s1252_s25 = sld [smem:[#allocation2 + $0x3f]] }
 0x141   :  { %v414_v51 = vsel %vm328_vm2, %v412_v7, %v413_v38  ;;  %v415_v52 = vsel %vm328_vm2, %v413_v38, %v412_v7  ;;  %v422_v53 = vmul.f32 %v1637_v26, %v364_v3  ;;  %v424_v54 = vmul.f32 %v1693_v47, %v376_v34  ;;  %vm1928_vm2 = vmand %vm1615_vm0, %vm52_vm14 }
 0x142   :  { %v418_v0 = vsel %vm333_vm5, %v416_v45, %v417_v18  ;;  %v419_v57 = vsel %vm333_vm5, %v417_v18, %v416_v45  ;;  %v425_v56 = vmul.f32 %v1697_v48, %v377_v35  ;;  %v428_v8 = vmul.f32 %v410_v44, %v1641_v27 }
 0x143   :  { %v420_v58 = vsel %vm1615_vm0, %v419_v57, %v414_v51  ;;  %v426_v62 = vsub.f32 %v422_v53, %v424_v54  ;;  %v436_v9 = vmul.f32 %v1637_v26, %v376_v34  ;;  %v437_v12 = vmul.f32 %v1652_v32, %v377_v35 }
 0x144   :  { %v423_v16 = vmul.f32 %v1652_v32, %v365_v5  ;;  %v432_v22 = vmul.f32 %v420_v58, %v1701_v49  ;;  %v438_v23 = vmul.f32 %v1693_v47, %v364_v3  ;;  %v442_v24 = vmul.f32 %v420_v58, %v1641_v27 }
 0x145   :  { %v430_v20 = vadd.f32 %v428_v8, %v426_v62  ;;  %v439_v28 = vmul.f32 %v1697_v48, %v365_v5  ;;  %v411_v26 = vsel %vm1596_vm12, %v408_v37, %v405_v41  ;;  %v421_v29 = vsel %vm1596_vm12, %v418_v0, %v415_v52 }
 0x146   :  { %v440_v32 = vadd.f32 %v438_v23, %v436_v9  ;;  %v427_v30 = vsub.f32 %v423_v16, %v425_v56  ;;  %v429_v47 = vmul.f32 %v411_v26, %v1705_v50  ;;  %v433_v27 = vmul.f32 %v421_v29, %v1715_v55 }
 0x147   :  { %v434_v3 = vsub.f32 %v430_v20, %v432_v22  ;;  %v441_v10 = vadd.f32 %v439_v28, %v437_v12  ;;  %v443_v48 = vmul.f32 %v421_v29, %v1705_v50  ;;  %v460_v5 = vsel %vm52_vm14, %v458_v42, %v459_v43 }
 0x148   :  { %v444_v31 = vadd.f32 %v442_v24, %v440_v32  ;;  %v446_v34 = vmul.f32 %v410_v44, %v1701_v49  ;;  %v431_v35 = vadd.f32 %v429_v47, %v427_v30  ;;  %v464_v40 = vsel %vm52_vm14, %v462_v60, %v463_v61 }
 0x149   :  { %v445_v41 = vadd.f32 %v443_v48, %v441_v10  ;;  %v447_v37 = vmul.f32 %v411_v26, %v1715_v55  ;;  %v469_v50 = vsel %vm53_vm13, %v466_v19, %v467_v15  ;;  %v473_v42 = vsel %vm53_vm13, %v470_v46, %v471_v33 }
 0x14a   :  { %v448_v43 = vadd.f32 %v446_v34, %v444_v31  ;;  %v435_v49 = vsub.f32 %v431_v35, %v433_v27  ;;  %v474_v36 = vrot.slane %v434_v3, 2  ;;  %v478_v7 = vrot.slane %v434_v3, 6 }
 0x14b   :  { %v449_v38 = vadd.f32 %v447_v37, %v445_v41  ;;  %v468_v60 = vsel %vm52_vm14, %v466_v19, %v467_v15  ;;  %v472_v55 = vsel %vm52_vm14, %v470_v46, %v471_v33  ;;  %v494_v61 = vmul.f32 %v460_v5, %v434_v3 }
 0x14c   :  { %v475_v44 = vrot.slane %v435_v49, 2  ;;  %v479_v45 = vrot.slane %v435_v49, 6  ;;  %v484_v18 = vrot.slane %v448_v43, 2  ;;  %v488_v51 = vrot.slane %v448_v43, 6 }
 0x14d   :  { %v485_v52 = vrot.slane %v449_v38, 2  ;;  %v489_v53 = vrot.slane %v449_v38, 6  ;;  %v495_v54 = vmul.f32 %v1723_v59, %v435_v49  ;;  %v497_v0 = vmul.f32 %v1742_v14, %v449_v38 }
 0x14e   :  { %v477_v57 = vsel %vm354_vm8, %v475_v44, %v474_v36  ;;  %v480_v15 = vsel %vm359_vm10, %v478_v7, %v479_v45  ;;  %v476_v19 = vsel %vm354_vm8, %v474_v36, %v475_v44  ;;  %v481_v33 = vsel %vm359_vm10, %v479_v45, %v478_v7 }
 0x14f   :  { %v483_v46 = vsel %vm53_vm13, %v480_v15, %v477_v57  ;;  %v487_v56 = vsel %vm354_vm8, %v485_v52, %v484_v18  ;;  %v490_v8 = vsel %vm359_vm10, %v488_v51, %v489_v53  ;;  %v499_v58 = vsub.f32 %v495_v54, %v497_v0 }
 0x150   :  { %v493_v62 = vsel %vm53_vm13, %v490_v8, %v487_v56  ;;  %v501_v9 = vmul.f32 %v483_v46, %v469_v50  ;;  %v482_v12 = vsel %vm52_vm14, %v481_v33, %v476_v19  ;;  %v486_v16 = vsel %vm354_vm8, %v484_v18, %v485_v52 }
 0x151   :  { %v505_v22 = vmul.f32 %v493_v62, %v473_v42  ;;  %v491_v23 = vsel %vm359_vm10, %v489_v53, %v488_v51  ;;  %v496_v24 = vmul.f32 %v464_v40, %v448_v43  ;;  %v500_v20 = vmul.f32 %v482_v12, %v468_v60 }
 0x152   :  { %v503_v28 = vadd.f32 %v501_v9, %v499_v58  ;;  %v492_v26 = vsel %vm52_vm14, %v491_v23, %v486_v16  ;;  %v509_v29 = vmul.f32 %v1723_v59, %v449_v38  ;;  %v511_v32 = vmul.f32 %v1742_v14, %v435_v49 }
 0x153   :  { %v498_v30 = vsub.f32 %v494_v61, %v496_v24  ;;  %v504_v47 = vmul.f32 %v492_v26, %v472_v55  ;;  %v515_v27 = vmul.f32 %v493_v62, %v469_v50  ;;  %v510_v10 = vmul.f32 %v464_v40, %v434_v3 }
 0x154   :  { %v507_v48 = vsub.f32 %v503_v28, %v505_v22  ;;  %v513_v31 = vadd.f32 %v511_v32, %v509_v29  ;;  %v508_v34 = vmul.f32 %v460_v5, %v448_v43  ;;  %v514_v35 = vmul.f32 %v492_v26, %v468_v60 }
 0x155   :  { %v502_v37 = vadd.f32 %v500_v20, %v498_v30  ;;  %v519_v14 = vmul.f32 %v483_v46, %v473_v42  ;;  %v518_v43 = vmul.f32 %v482_v12, %v472_v55  ;;  %v54_v18 = vshra.s32 %v1350_v2, 5 }
 0x156   :  { %v525_v59 = vsub.f32 0.0, %v507_v48  ;;  %v517_v36 = vadd.f32 %v515_v27, %v513_v31  ;;  %v512_v49 = vadd.f32 %v510_v10, %v508_v34  ;;  %v60_v22 = vshra.s32 %v1350_v2, 3 }
 0x157   :  { %v506_v7 = vsub.f32 %v502_v37, %v504_v47  ;;  %v1947_v51 = vand.u32 1, %v54_v18 }
 0x158   :  { %v527_v3 = vsel %vm1918_vm15, %v525_v59, %v507_v48  ;;  %v521_v40 = vadd.f32 %v519_v14, %v517_v36  ;;  %v516_v50 = vadd.f32 %v514_v35, %v512_v49  ;;  %v1975_v23 = vand.u32 1, %v60_v22 }
 0x159   :  { %534 = vrot.lane.b32.xlu0 %v527_v3, %s1318_s26  ;;  %v524_v42 = vsub.f32 0.0, %v506_v7  ;;  %vm56_vm3 = vcmp.eq.s32.totalorder %v1947_v51, 1  ;;  %v2019_v59 = vand.u32 1, %v57_v21 }
 0x15a   :  { %v520_v38 = vadd.f32 %v518_v43, %v516_v50  ;;  %v529_v61 = vsub.f32 0.0, %v521_v40  ;;  %vm62_vm5 = vcmp.eq.s32.totalorder %v1975_v23, 1 }
 0x15b   :  { %v526_v60 = vsel %vm1928_vm2, %v524_v42, %v506_v7 }
 0x15c   :  { %532 = vrot.lane.b32.xlu1 %v526_v60, %s1318_s26  ;;  %v528_v44 = vsub.f32 0.0, %v520_v38  ;;  %v531_v55 = vsel %vm1918_vm15, %v529_v61, %v521_v40 }
 0x15d   :  { %538 = vrot.lane.b32.xlu0 %v527_v3, %s1319_s27 }
 0x15e   :  { %v530_v45 = vsel %vm1928_vm2, %v528_v44, %v520_v38 }
 0x160   :  { %536 = vrot.lane.b32.xlu1 %v526_v60, %s1319_s27 }
 0x161   :  { %546 = vrot.lane.b32.xlu0 %v531_v55, %s1318_s26 }
 0x164   :  { %544 = vrot.lane.b32.xlu1 %v530_v45, %s1318_s26 }
 0x165   :  { %550 = vrot.lane.b32.xlu0 %v531_v55, %s1319_s27 }
 0x168   :  { %548 = vrot.lane.b32.xlu1 %v530_v45, %s1319_s27 }
 0x1cb   :  { %v535_v52 = vpop.permute.xlu0 %534 }
 0x1ce   :  { %v533_v53 = vpop.permute.xlu1 %532 }
 0x1cf   :  { %v539_v54 = vpop.permute.xlu0 %538 }
 0x1d0   :  { %v541_v0 = vsel %vm56_vm3, %v539_v54, %v535_v52 }
 0x1d1   :  { %v543_v57 = vsel %vm1596_vm12, %v541_v0, %v527_v3 }
 0x1d2   :  { %v537_v15 = vpop.permute.xlu1 %536  ;;  %558 = vrot.lane.b32.xlu0 %v543_v57, %s1320_s28 }
 0x1d3   :  { %v540_v19 = vsel %vm56_vm3, %v537_v15, %v533_v53  ;;  %v547_v33 = vpop.permute.xlu0 %546 }
 0x1d4   :  { %v542_v46 = vsel %vm1615_vm0, %v540_v19, %v526_v60 }
 0x1d5   :  { %556 = vrot.lane.b32.xlu1 %v542_v46, %s1320_s28 }
 0x1d6   :  { %v545_v56 = vpop.permute.xlu1 %544  ;;  %562 = vrot.lane.b32.xlu0 %v543_v57, %s1321_s29 }
 0x1d7   :  { %v551_v8 = vpop.permute.xlu0 %550 }
 0x1d8   :  { %v553_v58 = vsel %vm56_vm3, %v551_v8, %v547_v33  ;;  %v637_v33 = vstv %s1229_s6  ;;  %v639_v8 = vstv %s1236_s9  ;;  %s1253_s6 = sld [smem:[#allocation2 + $0x40]]  ;;  %s1260_s9 = sld [smem:[#allocation2 + $0x47]] }
 0x1d9   :  { %560 = vrot.lane.b32.xlu1 %v542_v46, %s1321_s29  ;;  %v555_v62 = vsel %vm1596_vm12, %v553_v58, %v531_v55  ;;  %v640_v58 = vstv %s1230_s7  ;;  %s1259_s7 = sld [smem:[#allocation2 + $0x46]] }
 0x1da   :  { %v549_v9 = vpop.permute.xlu1 %548  ;;  %570 = vrot.lane.b32.xlu0 %v555_v62, %s1320_s28 }
 0x1db   :  { %v552_v12 = vsel %vm56_vm3, %v549_v9, %v545_v56  ;;  %v636_v56 = vstv %s1235_s8  ;;  %s2140_s8 = sld [smem:[#allocation2 + $0x41]] }
 0x1dc   :  { %v554_v16 = vsel %vm1615_vm0, %v552_v12, %v530_v45  ;;  %v638_v12 = vsel %vm56_vm3, %v636_v56, %v637_v33 }
 0x1dd   :  { %568 = vrot.lane.b32.xlu1 %v554_v16, %s1320_s28 }
 0x1de   :  { %574 = vrot.lane.b32.xlu0 %v555_v62, %s1321_s29 }
 0x1e1   :  { %572 = vrot.lane.b32.xlu1 %v554_v16, %s1321_s29  ;;  %v641_v16 = vsel %vm56_vm3, %v639_v8, %v640_v58 }
 0x244   :  { %v559_v24 = vpop.permute.xlu0 %558 }
 0x247   :  { %v557_v20 = vpop.permute.xlu1 %556 }
 0x248   :  { %v563_v28 = vpop.permute.xlu0 %562 }
 0x249   :  { %v565_v26 = vsel %vm62_vm5, %v563_v28, %v559_v24 }
 0x24a   :  { %v1982_v29 = vsel %vm1596_vm12, %v565_v26, %v527_v3 }
 0x24b   :  { %v561_v32 = vpop.permute.xlu1 %560  ;;  %582 = vrot.lane.b32.xlu0 %v1982_v29, %s1322_s30 }
 0x24c   :  { %v564_v30 = vsel %vm62_vm5, %v561_v32, %v557_v20  ;;  %v571_v47 = vpop.permute.xlu0 %570 }
 0x24d   :  { %v1990_v27 = vsel %vm1615_vm0, %v564_v30, %v526_v60 }
 0x24e   :  { %580 = vrot.lane.b32.xlu1 %v1990_v27, %s1322_s30 }
 0x24f   :  { %v569_v10 = vpop.permute.xlu1 %568  ;;  %586 = vrot.lane.b32.xlu0 %v1982_v29, %s1323_s3 }
 0x250   :  { %v575_v48 = vpop.permute.xlu0 %574 }
 0x251   :  { %v577_v31 = vsel %vm62_vm5, %v575_v48, %v571_v47 }
 0x252   :  { %584 = vrot.lane.b32.xlu1 %v1990_v27, %s1323_s3  ;;  %v2002_v34 = vsel %vm1596_vm12, %v577_v31, %v531_v55  ;;  %vm59_vm12 = vcmp.eq.s32.totalorder %v2019_v59, 1 }
 0x253   :  { %v573_v35 = vpop.permute.xlu1 %572  ;;  %594 = vrot.lane.b32.xlu0 %v2002_v34, %s1322_s30 }
 0x254   :  { %v576_v41 = vsel %vm62_vm5, %v573_v35, %v569_v10 }
 0x255   :  { %v2010_v37 = vsel %vm1615_vm0, %v576_v41, %v530_v45  ;;  %v63_v45 = vshra.s32 %v1350_v2, 2 }
 0x256   :  { %592 = vrot.lane.b32.xlu1 %v2010_v37, %s1322_s30 }
 0x257   :  { %598 = vrot.lane.b32.xlu0 %v2002_v34, %s1323_s3  ;;  %v2051_v18 = vand.u32 1, %v63_v45 }
 0x259   :  { %vm65_vm0 = vcmp.eq.s32.totalorder %v2051_v18, 1 }
 0x25a   :  { %596 = vrot.lane.b32.xlu1 %v2010_v37, %s1323_s3 }
 0x2bd   :  { %v583_v36 = vpop.permute.xlu0 %582 }
 0x2c0   :  { %v581_v14 = vpop.permute.xlu1 %580 }
 0x2c1   :  { %v587_v11 = vpop.permute.xlu0 %586 }
 0x2c2   :  { %v589_v49 = vsel %vm59_vm12, %v587_v11, %v583_v36 }
 0x2c3   :  { %v591_v7 = vsel %vm53_vm13, %v589_v49, %v1982_v29 }
 0x2c4   :  { %v585_v3 = vpop.permute.xlu1 %584  ;;  %606 = vrot.lane.b32.xlu0 %v591_v7, %s1324_s4 }
 0x2c5   :  { %v588_v5 = vsel %vm59_vm12, %v585_v3, %v581_v14  ;;  %v595_v40 = vpop.permute.xlu0 %594  ;;  %v643_v14 = vstv %s1231_s10  ;;  %s1256_s10 = sld [smem:[#allocation2 + $0x43]] }
 0x2c6   :  { %v590_v50 = vsel %vm52_vm14, %v588_v5, %v1990_v27 }
 0x2c7   :  { %604 = vrot.lane.b32.xlu1 %v590_v50, %s1324_s4 }
 0x2c8   :  { %v593_v43 = vpop.permute.xlu1 %592  ;;  %610 = vrot.lane.b32.xlu0 %v591_v7, %s1325_s5 }
 0x2c9   :  { %v599_v42 = vpop.permute.xlu0 %598 }
 0x2ca   :  { %v601_v38 = vsel %vm59_vm12, %v599_v42, %v595_v40  ;;  %v645_v40 = vstv %s1234_s13  ;;  %s1261_s13 = sld [smem:[#allocation2 + $0x48]] }
 0x2cb   :  { %608 = vrot.lane.b32.xlu1 %v590_v50, %s1325_s5  ;;  %v603_v60 = vsel %vm53_vm13, %v601_v38, %v2002_v34  ;;  %v646_v50 = vstv %s1232_s12  ;;  %s1329_s12 = smov 1  }
 0x2cc   :  { %v597_v61 = vpop.permute.xlu1 %596  ;;  %618 = vrot.lane.b32.xlu0 %v603_v60, %s1324_s4 }
 0x2cd   :  { %v600_v44 = vsel %vm59_vm12, %v597_v61, %v593_v43  ;;  %v704_v61 = vstv %s1243_s15  ;;  %s1262_s15 = sld [smem:[#allocation2 + $0x49]] }
 0x2ce   :  { %v602_v55 = vsel %vm52_vm14, %v600_v44, %v2010_v37  ;;  %v705_v44 = vstv %s1237_s14  ;;  %s1267_s14 = sld [smem:[#allocation2 + $0x4e]] }
 0x2cf   :  { %616 = vrot.lane.b32.xlu1 %v602_v55, %s1324_s4  ;;  %v706_v33 = vsel %vm62_vm5, %v704_v61, %v705_v44  ;;  %v773_v61 = vstv %s1245_s22  ;;  %s2270_s22 = sld [smem:[#allocation2 + $0x51]] }
 0x2d0   :  { %622 = vrot.lane.b32.xlu0 %v603_v60, %s1325_s5 }
 0x2d3   :  { %620 = vrot.lane.b32.xlu1 %v602_v55, %s1325_s5  ;;  %v647_v55 = vsel %vm56_vm3, %v645_v40, %v646_v50  ;;  %v714_v40 = vstv %s1240_s20  ;;  %s1266_s20 = sld [smem:[#allocation2 + $0x4d]] }
 0x336   :  { %v607_v52 = vpop.permute.xlu0 %606 }
 0x339   :  { %v605_v53 = vpop.permute.xlu1 %604 }
 0x33a   :  { %v611_v54 = vpop.permute.xlu0 %610 }
 0x33b   :  { %v613_v0 = vsel %vm65_vm0, %v611_v54, %v607_v52 }
 0x33c   :  { %v615_v57 = vsel %vm53_vm13, %v613_v0, %v1982_v29 }
 0x33d   :  { %v609_v15 = vpop.permute.xlu1 %608  ;;  %650 = vrot.lane.b32.xlu0 %v615_v57, %s1318_s26  ;;  %v669_v28 = vmul.f32 %v638_v12, %v615_v57  ;;  %v685_v26 = vmul.f32 %v641_v16, %v615_v57 }
 0x33e   :  { %v612_v19 = vsel %vm65_vm0, %v609_v15, %v605_v53  ;;  %v619_v46 = vpop.permute.xlu0 %618  ;;  %v708_v53 = vstv %s2086_s16  ;;  %v707_v15 = vstv %s1244_s17  ;;  %s1268_s16 = sld [smem:[#allocation2 + $0x4f]]  ;;  %s1263_s17 = sld [smem:[#allocation2 + $0x4a]] }
 0x33f   :  { %v614_v62 = vsel %vm52_vm14, %v612_v19, %v1990_v27 }
 0x340   :  { %648 = vrot.lane.b32.xlu1 %v614_v62, %s1318_s26  ;;  %v668_v31 = vmul.f32 %v638_v12, %v614_v62  ;;  %v684_v35 = vmul.f32 %v641_v16, %v614_v62 }
 0x341   :  { %v617_v9 = vpop.permute.xlu1 %616  ;;  %654 = vrot.lane.b32.xlu0 %v615_v57, %s1319_s27 }
 0x342   :  { %v623_v22 = vpop.permute.xlu0 %622 }
 0x343   :  { %v625_v24 = vsel %vm65_vm0, %v623_v22, %v619_v46 }
 0x344   :  { %652 = vrot.lane.b32.xlu1 %v614_v62, %s1319_s27  ;;  %v627_v20 = vsel %vm53_vm13, %v625_v24, %v2002_v34 }
 0x345   :  { %v621_v29 = vpop.permute.xlu1 %620  ;;  %660 = vrot.lane.b32.xlu0 %v627_v20, %s1318_s26  ;;  %v671_v32 = vmul.f32 %v641_v16, %v627_v20  ;;  %v683_v30 = vmul.f32 %v638_v12, %v627_v20 }
 0x346   :  { %v624_v47 = vsel %vm65_vm0, %v621_v29, %v617_v9 }
 0x347   :  { %v626_v27 = vsel %vm52_vm14, %v624_v47, %v2010_v37  ;;  %v673_v10 = vsub.f32 %v669_v28, %v671_v32  ;;  %v687_v48 = vadd.f32 %v685_v26, %v683_v30  ;;  %v642_v37 = vstv %s1233_s11  ;;  %s1258_s11 = sld [smem:[#allocation2 + $0x45]] }
 0x348   :  { %658 = vrot.lane.b32.xlu1 %v626_v27, %s1318_s26  ;;  %v670_v63 = vmul.f32 %v641_v16, %v626_v27  ;;  %v682_v34 = vmul.f32 %v638_v12, %v626_v27  ;;  %v644_v49 = vsel %vm56_vm3, %v642_v37, %v643_v14  ;;  %v709_v16 = vsel %vm62_vm5, %v707_v15, %v708_v53  ;;  %s1247_s26 = sld [smem:[#allocation2 + $0x3a]] }
 0x349   :  { %664 = vrot.lane.b32.xlu0 %v627_v20, %s1319_s27  ;;  %v711_v37 = vstv %s1239_s18  ;;  %s1265_s18 = sld [smem:[#allocation2 + $0x4c]]  ;;  %vm1182_vm14 = vcmp.lt.s32.totalorder %v1350_v2, 11 }
 0x34a   :  { %v672_v41 = vsub.f32 %v668_v31, %v670_v63  ;;  %v686_v21 = vadd.f32 %v684_v35, %v682_v34 }
 0x34c   :  { %662 = vrot.lane.b32.xlu1 %v626_v27, %s1319_s27  ;;  %s1249_s27 = sld [smem:[#allocation2 + $0x3c]] }
 0x3af   :  { %v651_v36 = vpop.permute.xlu0 %650 }
 0x3b2   :  { %v649_v17 = vpop.permute.xlu1 %648 }
 0x3b3   :  { %v655_v11 = vpop.permute.xlu0 %654 }
 0x3b4   :  { %v657_v7 = vsel %vm56_vm3, %v655_v11, %v651_v36 }
 0x3b5   :  { %v675_v43 = vmul.f32 %v657_v7, %v644_v49  ;;  %v693_v46 = vmul.f32 %v657_v7, %v647_v55 }
 0x3b6   :  { %v653_v3 = vpop.permute.xlu1 %652 }
 0x3b7   :  { %v661_v5 = vpop.permute.xlu0 %660  ;;  %v656_v42 = vsel %vm56_vm3, %v653_v3, %v649_v17  ;;  %v677_v54 = vadd.f32 %v675_v43, %v673_v10  ;;  %v710_v17 = vstv %s1241_s19  ;;  %s1264_s19 = sld [smem:[#allocation2 + $0x4b]] }
 0x3b8   :  { %v674_v45 = vmul.f32 %v656_v42, %v644_v49  ;;  %v692_v24 = vmul.f32 %v656_v42, %v647_v55  ;;  %v712_v11 = vsel %vm62_vm5, %v710_v17, %v711_v37 }
 0x3ba   :  { %v659_v38 = vpop.permute.xlu1 %658  ;;  %v676_v62 = vadd.f32 %v674_v45, %v672_v41 }
 0x3bb   :  { %v665_v60 = vpop.permute.xlu0 %664 }
 0x3bc   :  { %v667_v52 = vsel %vm56_vm3, %v665_v60, %v661_v5  ;;  %v713_v5 = vstv %s1242_s21  ;;  %v772_v60 = vstv %s1251_s23  ;;  %s2268_s21 = sld [smem:[#allocation2 + $0x50]]  ;;  %s1275_s23 = sld [smem:[#allocation2 + $0x56]] }
 0x3bd   :  { %v679_v0 = vmul.f32 %v667_v52, %v647_v55  ;;  %v689_v57 = vmul.f32 %v667_v52, %v644_v49  ;;  %v715_v44 = vsel %vm62_vm5, %v713_v5, %v714_v40  ;;  %v776_v52 = vstv %s2113_s24  ;;  %s1276_s24 = sld [smem:[#allocation2 + $0x57]] }
 0x3be   :  { %v663_v19 = vpop.permute.xlu1 %662 }
 0x3bf   :  { %v681_v56 = vsub.f32 %v677_v54, %v679_v0  ;;  %v691_v8 = vadd.f32 %v689_v57, %v687_v48  ;;  %v666_v58 = vsel %vm56_vm3, %v663_v19, %v659_v38  ;;  %v775_v57 = vstv %s1252_s25  ;;  %s1271_s25 = sld [smem:[#allocation2 + $0x52]] }
 0x3c0   :  { %v678_v9 = vmul.f32 %v666_v58, %v647_v55  ;;  %v688_v12 = vmul.f32 %v666_v58, %v644_v49  ;;  %v774_v19 = vsel %vm59_vm12, %v772_v60, %v773_v61 }
 0x3c1   :  { %v695_v22 = vadd.f32 %v693_v46, %v691_v8  ;;  %718 = vrot.lane.b32.xlu0 %v681_v56, %s1320_s28  ;;  %v737_v29 = vmul.f32 %v706_v33, %v681_v56  ;;  %v753_v30 = vmul.f32 %v709_v16, %v681_v56 }
 0x3c2   :  { %v680_v20 = vsub.f32 %v676_v62, %v678_v9  ;;  %v690_v28 = vadd.f32 %v688_v12, %v686_v21  ;;  %v777_v12 = vsel %vm59_vm12, %v775_v57, %v776_v52 }
 0x3c3   :  { %v739_v26 = vmul.f32 %v709_v16, %v695_v22  ;;  %v751_v32 = vmul.f32 %v706_v33, %v695_v22 }
 0x3c4   :  { %v694_v47 = vadd.f32 %v692_v24, %v690_v28  ;;  %716 = vrot.lane.b32.xlu1 %v680_v20, %s1320_s28  ;;  %v736_v31 = vmul.f32 %v706_v33, %v680_v20  ;;  %v752_v63 = vmul.f32 %v709_v16, %v680_v20 }
 0x3c5   :  { %722 = vrot.lane.b32.xlu0 %v681_v56, %s1321_s29  ;;  %v741_v27 = vsub.f32 %v737_v29, %v739_v26  ;;  %v755_v10 = vadd.f32 %v753_v30, %v751_v32 }
 0x3c6   :  { %v738_v48 = vmul.f32 %v709_v16, %v694_v47  ;;  %v750_v35 = vmul.f32 %v706_v33, %v694_v47 }
 0x3c8   :  { %720 = vrot.lane.b32.xlu1 %v680_v20, %s1321_s29  ;;  %v740_v34 = vsub.f32 %v736_v31, %v738_v48  ;;  %v754_v41 = vadd.f32 %v752_v63, %v750_v35 }
 0x3c9   :  { %728 = vrot.lane.b32.xlu0 %v695_v22, %s1320_s28 }
 0x3cc   :  { %726 = vrot.lane.b32.xlu1 %v694_v47, %s1320_s28  ;;  %s1248_s28 = sld [smem:[#allocation2 + $0x3b]] }
 0x3cd   :  { %732 = vrot.lane.b32.xlu0 %v695_v22, %s1321_s29 }
 0x3d0   :  { %730 = vrot.lane.b32.xlu1 %v694_v47, %s1321_s29  ;;  %s1250_s29 = sld [smem:[#allocation2 + $0x3d]] }
 0x433   :  { %v719_v21 = vpop.permute.xlu0 %718 }
 0x436   :  { %v717_v36 = vpop.permute.xlu1 %716 }
 0x437   :  { %v723_v14 = vpop.permute.xlu0 %722 }
 0x438   :  { %v725_v49 = vsel %vm62_vm5, %v723_v14, %v719_v21  ;;  %v778_v21 = vstv %s1249_s27  ;;  %s1272_s27 = sld [smem:[#allocation2 + $0x53]] }
 0x439   :  { %v743_v50 = vmul.f32 %v725_v49, %v712_v11  ;;  %v761_v33 = vmul.f32 %v725_v49, %v715_v44 }
 0x43a   :  { %v721_v7 = vpop.permute.xlu1 %720 }
 0x43b   :  { %v729_v3 = vpop.permute.xlu0 %728  ;;  %v724_v43 = vsel %vm62_vm5, %v721_v7, %v717_v36  ;;  %v745_v53 = vadd.f32 %v743_v50, %v741_v27  ;;  %v779_v36 = vstv %s1247_s26  ;;  %v781_v7 = vstv %s1250_s29  ;;  %s1273_s26 = sld [smem:[#allocation2 + $0x54]] }
 0x43c   :  { %v742_v55 = vmul.f32 %v724_v43, %v712_v11  ;;  %v760_v22 = vmul.f32 %v724_v43, %v715_v44  ;;  %v780_v37 = vsel %vm59_vm12, %v778_v21, %v779_v36 }
 0x43e   :  { %v727_v42 = vpop.permute.xlu1 %726  ;;  %v744_v58 = vadd.f32 %v742_v55, %v740_v34  ;;  %v844_v55 = vstv %s2140_s8 }
 0x43f   :  { %v733_v38 = vpop.permute.xlu0 %732 }
 0x440   :  { %v735_v45 = vsel %vm62_vm5, %v733_v38, %v729_v3  ;;  %v782_v3 = vstv %s1248_s28  ;;  %v841_v38 = vstv %s1253_s6  ;;  %s1274_s28 = sld [smem:[#allocation2 + $0x55]] }
 0x441   :  { %v747_v54 = vmul.f32 %v735_v45, %v715_v44  ;;  %v757_v0 = vmul.f32 %v735_v45, %v712_v11  ;;  %v783_v60 = vsel %vm59_vm12, %v781_v7, %v782_v3 }
 0x442   :  { %v731_v15 = vpop.permute.xlu1 %730 }
 0x443   :  { %v749_v46 = vsub.f32 %v745_v53, %v747_v54  ;;  %v759_v56 = vadd.f32 %v757_v0, %v755_v10  ;;  %v734_v8 = vsel %vm62_vm5, %v731_v15, %v727_v42  ;;  %v840_v42 = vstv %s1259_s7 }
 0x444   :  { %v746_v62 = vmul.f32 %v734_v8, %v715_v44  ;;  %v756_v9 = vmul.f32 %v734_v8, %v712_v11  ;;  %v843_v54 = vstv %s1260_s9  ;;  %v842_v57 = vsel %vm65_vm0, %v840_v42, %v841_v38 }
 0x445   :  { %v763_v16 = vadd.f32 %v761_v33, %v759_v56  ;;  %786 = vrot.lane.b32.xlu0 %v749_v46, %s1322_s30  ;;  %v805_v26 = vmul.f32 %v774_v19, %v749_v46  ;;  %v821_v32 = vmul.f32 %v777_v12, %v749_v46 }
 0x446   :  { %v748_v24 = vsub.f32 %v744_v58, %v746_v62  ;;  %v758_v20 = vadd.f32 %v756_v9, %v754_v41  ;;  %v845_v62 = vsel %vm65_vm0, %v843_v54, %v844_v55 }
 0x447   :  { %v807_v28 = vmul.f32 %v777_v12, %v763_v16  ;;  %v819_v29 = vmul.f32 %v774_v19, %v763_v16 }
 0x448   :  { %v762_v30 = vadd.f32 %v760_v22, %v758_v20  ;;  %784 = vrot.lane.b32.xlu1 %v748_v24, %s1322_s30  ;;  %v804_v10 = vmul.f32 %v774_v19, %v748_v24  ;;  %v820_v31 = vmul.f32 %v777_v12, %v748_v24 }
 0x449   :  { %790 = vrot.lane.b32.xlu0 %v749_v46, %s1323_s3  ;;  %v809_v23 = vsub.f32 %v805_v26, %v807_v28  ;;  %v823_v47 = vadd.f32 %v821_v32, %v819_v29 }
 0x44a   :  { %v806_v27 = vmul.f32 %v777_v12, %v762_v30  ;;  %v818_v48 = vmul.f32 %v774_v19, %v762_v30 }
 0x44c   :  { %788 = vrot.lane.b32.xlu1 %v748_v24, %s1323_s3  ;;  %v808_v35 = vsub.f32 %v804_v10, %v806_v27  ;;  %v822_v63 = vadd.f32 %v820_v31, %v818_v48 }
 0x44d   :  { %796 = vrot.lane.b32.xlu0 %v763_v16, %s1322_s30 }
 0x450   :  { %794 = vrot.lane.b32.xlu1 %v762_v30, %s1322_s30  ;;  %s1255_s30 = sld [smem:[#allocation2 + $0x42]] }
 0x451   :  { %800 = vrot.lane.b32.xlu0 %v763_v16, %s1323_s3 }
 0x454   :  { %798 = vrot.lane.b32.xlu1 %v762_v30, %s1323_s3  ;;  %s1257_s3 = sld [smem:[#allocation2 + $0x44]] }
 0x456   :  { %v847_v21 = vstv %s1255_s30 }
 0x4b7   :  { %v787_v34 = vpop.permute.xlu0 %786 }
 0x4ba   :  { %v785_v41 = vpop.permute.xlu1 %784 }
 0x4bb   :  { %v791_v17 = vpop.permute.xlu0 %790 }
 0x4bc   :  { %v793_v14 = vsel %vm59_vm12, %v791_v17, %v787_v34 }
 0x4bd   :  { %v811_v5 = vmul.f32 %v793_v14, %v780_v37  ;;  %v829_v15 = vmul.f32 %v793_v14, %v783_v60 }
 0x4be   :  { %v789_v11 = vpop.permute.xlu1 %788 }
 0x4bf   :  { %v797_v49 = vpop.permute.xlu0 %796  ;;  %v792_v40 = vsel %vm59_vm12, %v789_v11, %v785_v41  ;;  %v813_v45 = vadd.f32 %v811_v5, %v809_v23  ;;  %v846_v41 = vstv %s1257_s3  ;;  %v849_v11 = vstv %s1258_s11 }
 0x4c0   :  { %v810_v61 = vmul.f32 %v792_v40, %v780_v37  ;;  %v828_v12 = vmul.f32 %v792_v40, %v783_v60  ;;  %v848_v17 = vsel %vm65_vm0, %v846_v41, %v847_v21 }
 0x4c2   :  { %v795_v50 = vpop.permute.xlu1 %794  ;;  %v812_v56 = vadd.f32 %v810_v61, %v808_v35 }
 0x4c3   :  { %v801_v43 = vpop.permute.xlu0 %800 }
 0x4c4   :  { %v803_v44 = vsel %vm59_vm12, %v801_v43, %v797_v49  ;;  %v850_v49 = vstv %s1256_s10 }
 0x4c5   :  { %v815_v52 = vmul.f32 %v803_v44, %v783_v60  ;;  %v825_v53 = vmul.f32 %v803_v44, %v780_v37 }
 0x4c6   :  { %v799_v0 = vpop.permute.xlu1 %798 }
 0x4c7   :  { %v817_v19 = vsub.f32 %v813_v45, %v815_v52  ;;  %v827_v33 = vadd.f32 %v825_v53, %v823_v47  ;;  %v802_v46 = vsel %vm59_vm12, %v799_v0, %v795_v50  ;;  %v851_v50 = vsel %vm65_vm0, %v849_v11, %v850_v49 }
 0x4c8   :  { %v814_v8 = vmul.f32 %v802_v46, %v783_v60  ;;  %v824_v58 = vmul.f32 %v802_v46, %v780_v37 }
 0x4c9   :  { %v831_v9 = vadd.f32 %v829_v15, %v827_v33  ;;  %854 = vrot.lane.b32.xlu0 %v817_v19, %s1324_s4  ;;  %v873_v20 = vmul.f32 %v842_v57, %v817_v19  ;;  %v889_v26 = vmul.f32 %v845_v62, %v817_v19 }
 0x4ca   :  { %v816_v16 = vsub.f32 %v812_v56, %v814_v8  ;;  %v826_v22 = vadd.f32 %v824_v58, %v822_v63 }
 0x4cb   :  { %v875_v24 = vmul.f32 %v845_v62, %v831_v9  ;;  %v887_v28 = vmul.f32 %v842_v57, %v831_v9 }
 0x4cc   :  { %v830_v29 = vadd.f32 %v828_v12, %v826_v22  ;;  %852 = vrot.lane.b32.xlu1 %v816_v16, %s1324_s4  ;;  %v872_v47 = vmul.f32 %v842_v57, %v816_v16  ;;  %v888_v10 = vmul.f32 %v845_v62, %v816_v16 }
 0x4cd   :  { %858 = vrot.lane.b32.xlu0 %v817_v19, %s1325_s5  ;;  %v877_v32 = vsub.f32 %v873_v20, %v875_v24  ;;  %v891_v30 = vadd.f32 %v889_v26, %v887_v28  ;;  %v66_v26 = vshra.s32 %v1350_v2, 1 }
 0x4ce   :  { %v874_v23 = vmul.f32 %v845_v62, %v830_v29  ;;  %v886_v27 = vmul.f32 %v842_v57, %v830_v29 }
 0x4d0   :  { %856 = vrot.lane.b32.xlu1 %v816_v16, %s1325_s5  ;;  %v876_v48 = vsub.f32 %v872_v47, %v874_v23  ;;  %v890_v31 = vadd.f32 %v888_v10, %v886_v27 }
 0x4d1   :  { %864 = vrot.lane.b32.xlu0 %v831_v9, %s1324_s4 }
 0x4d4   :  { %862 = vrot.lane.b32.xlu1 %v830_v29, %s1324_s4  ;;  %s1326_s4 = smov 126  }
 0x4d5   :  { %868 = vrot.lane.b32.xlu0 %v831_v9, %s1325_s5 }
 0x4d8   :  { %866 = vrot.lane.b32.xlu1 %v830_v29, %s1325_s5  ;;  %s1327_s5 = smov 2   ;;  %v2208_v29 = vand.u32 1, %v66_v26 }
 0x4da   :  { %vm68_vm13 = vcmp.eq.s32.totalorder %v2208_v29, 1 }
 0x53b   :  { %v855_v35 = vpop.permute.xlu0 %854 }
 0x53e   :  { %v853_v63 = vpop.permute.xlu1 %852 }
 0x53f   :  { %v859_v34 = vpop.permute.xlu0 %858 }
 0x540   :  { %v861_v37 = vsel %vm65_vm0, %v859_v34, %v855_v35 }
 0x541   :  { %v879_v3 = vmul.f32 %v861_v37, %v848_v17  ;;  %v897_v55 = vmul.f32 %v861_v37, %v851_v50  ;;  %v69_v37 = vand.u32 1, %v1350_v2 }
 0x542   :  { %v857_v36 = vpop.permute.xlu1 %856 }
 0x543   :  { %v865_v14 = vpop.permute.xlu0 %864  ;;  %v860_v7 = vsel %vm65_vm0, %v857_v36, %v853_v63  ;;  %v881_v61 = vadd.f32 %v879_v3, %v877_v32 }
 0x544   :  { %v878_v43 = vmul.f32 %v860_v7, %v848_v17  ;;  %v896_v15 = vmul.f32 %v860_v7, %v851_v50 }
 0x546   :  { %v863_v5 = vpop.permute.xlu1 %862  ;;  %v880_v53 = vadd.f32 %v878_v43, %v876_v48  ;;  %v973_v43 = vstv %s1261_s13 }
 0x547   :  { %v869_v40 = vpop.permute.xlu0 %868 }
 0x548   :  { %v871_v42 = vsel %vm65_vm0, %v869_v40, %v865_v14 }
 0x549   :  { %v883_v38 = vmul.f32 %v871_v42, %v851_v50  ;;  %v893_v60 = vmul.f32 %v871_v42, %v848_v17  ;;  %v975_v42 = vstv %s1268_s16 }
 0x54a   :  { %v867_v44 = vpop.permute.xlu1 %866 }
 0x54b   :  { %v895_v45 = vadd.f32 %v893_v60, %v891_v30  ;;  %v870_v52 = vsel %vm65_vm0, %v867_v44, %v863_v5  ;;  %v885_v54 = vsub.f32 %v881_v61, %v883_v38  ;;  %v976_v38 = vstv %s1262_s15 }
 0x54c   :  { %v882_v0 = vmul.f32 %v870_v52, %v851_v50  ;;  %v892_v57 = vmul.f32 %v870_v52, %v848_v17  ;;  %v972_v50 = vstv %s1267_s14 }
 0x54d   :  { %v899_v46 = vadd.f32 %v897_v55, %v895_v45  ;;  %v974_v44 = vsel %vm68_vm13, %v972_v50, %v973_v43  ;;  %v977_v55 = vsel %vm68_vm13, %v975_v42, %v976_v38 }
 0x54e   :  { %v884_v19 = vsub.f32 %v880_v53, %v882_v0  ;;  %v894_v33 = vadd.f32 %v892_v57, %v890_v31 }
 0x550   :  { %v901_v56 = vsel %vm56_vm3, %v884_v19, %v885_v54  ;;  %v900_v8 = vsel %vm56_vm3, %v885_v54, %v884_v19  ;;  %v898_v58 = vadd.f32 %v896_v15, %v894_v33 }
 0x551   :  { %906 = vrot.lane.b32.xlu0 %v901_v56, %s1317_s0  ;;  %904 = vrot.lane.b32.xlu1 %v900_v8, %s1317_s0 }
 0x552   :  { %v903_v18 = vsel %vm56_vm3, %v898_v58, %v899_v46  ;;  %v902_v62 = vsel %vm56_vm3, %v899_v46, %v898_v58 }
 0x555   :  { %912 = vrot.lane.b32.xlu0 %v903_v18, %s1317_s0  ;;  %910 = vrot.lane.b32.xlu1 %v902_v62, %s1317_s0  ;;  %s1328_s0 = smov 127  }
 0x5c3   :  { %v907_v9 = vpop.permute.xlu0 %906  ;;  %v905_v12 = vpop.permute.xlu1 %904 }
 0x5c4   :  { %v909_v16 = vsel %vm59_vm12, %v907_v9, %v901_v56  ;;  %v908_v22 = vsel %vm59_vm12, %v905_v12, %v900_v8 }
 0x5c5   :  { %918 = vrot.lane.b32.xlu0 %v909_v16, %s1326_s4  ;;  %916 = vrot.lane.b32.xlu1 %v908_v22, %s1326_s4 }
 0x5c7   :  { %v913_v24 = vpop.permute.xlu0 %912  ;;  %v911_v51 = vpop.permute.xlu1 %910 }
 0x5c8   :  { %v915_v20 = vsel %vm59_vm12, %v913_v24, %v903_v18  ;;  %v914_v28 = vsel %vm59_vm12, %v911_v51, %v902_v62  ;;  %v979_v24 = vstv %s1263_s17 }
 0x5c9   :  { %922 = vrot.lane.b32.xlu0 %v909_v16, %s1327_s5  ;;  %920 = vrot.lane.b32.xlu1 %v908_v22, %s1327_s5 }
 0x5cd   :  { %930 = vrot.lane.b32.xlu0 %v915_v20, %s1326_s4  ;;  %928 = vrot.lane.b32.xlu1 %v914_v28, %s1326_s4 }
 0x5d1   :  { %934 = vrot.lane.b32.xlu0 %v915_v20, %s1327_s5  ;;  %932 = vrot.lane.b32.xlu1 %v914_v28, %s1327_s5 }
 0x637   :  { %v919_v32 = vpop.permute.xlu0 %918  ;;  %v917_v30 = vpop.permute.xlu1 %916 }
 0x63b   :  { %v923_v23 = vpop.permute.xlu0 %922  ;;  %v921_v47 = vpop.permute.xlu1 %920 }
 0x63c   :  { %v925_v59 = vsel %vm68_vm13, %v923_v23, %v919_v32  ;;  %v924_v27 = vsel %vm68_vm13, %v921_v47, %v917_v30  ;;  %v981_v30 = vstv %s1266_s20  ;;  %v982_v23 = vstv %s1264_s19 }
 0x63d   :  { %v927_v10 = vsel %vm1564_vm9, %v925_v59, %v909_v16  ;;  %v926_v48 = vsel %vm1588_vm11, %v924_v27, %v908_v22  ;;  %v978_v22 = vstv %s1265_s18 }
 0x63e   :  { %942 = vrot.lane.b32.xlu0 %v927_v10, %s1328_s0  ;;  %940 = vrot.lane.b32.xlu1 %v926_v48, %s1328_s0 }
 0x63f   :  { %v931_v31 = vpop.permute.xlu0 %930  ;;  %v929_v35 = vpop.permute.xlu1 %928 }
 0x642   :  { %946 = vrot.lane.b32.xlu0 %v927_v10, %s1329_s12  ;;  %944 = vrot.lane.b32.xlu1 %v926_v48, %s1329_s12 }
 0x643   :  { %v935_v63 = vpop.permute.xlu0 %934  ;;  %v933_v34 = vpop.permute.xlu1 %932 }
 0x644   :  { %v937_v41 = vsel %vm68_vm13, %v935_v63, %v931_v31  ;;  %v936_v21 = vsel %vm68_vm13, %v933_v34, %v929_v35  ;;  %v1040_v63 = vstv %s1275_s23  ;;  %v1041_v34 = vstv %s2268_s21 }
 0x645   :  { %v939_v36 = vsel %vm1564_vm9, %v937_v41, %v915_v20  ;;  %v938_v17 = vsel %vm1588_vm11, %v936_v21, %v914_v28  ;;  %vm2236_vm9 = vcmp.eq.s32.totalorder %v69_v37, 1  ;;  %v980_v28 = vsel %vm68_vm13, %v978_v22, %v979_v24 }
 0x646   :  { %954 = vrot.lane.b32.xlu0 %v939_v36, %s1328_s0  ;;  %952 = vrot.lane.b32.xlu1 %v938_v17, %s1328_s0  ;;  %v1043_v41 = vstv %s1276_s24  ;;  %v1044_v21 = vstv %s2270_s22 }
 0x647   :  { %v1045_v50 = vsel %vm2236_vm9, %v1043_v41, %v1044_v21 }
 0x64a   :  { %958 = vrot.lane.b32.xlu0 %v939_v36, %s1329_s12  ;;  %956 = vrot.lane.b32.xlu1 %v938_v17, %s1329_s12 }
 0x6b0   :  { %v943_v14 = vpop.permute.xlu0 %942  ;;  %v941_v11 = vpop.permute.xlu1 %940 }
 0x6b4   :  { %v947_v13 = vpop.permute.xlu0 %946  ;;  %v945_v49 = vpop.permute.xlu1 %944 }
 0x6b5   :  { %v949_v7 = vsel %vm2236_vm9, %v947_v13, %v943_v14  ;;  %v948_v3 = vsel %vm2236_vm9, %v945_v49, %v941_v11 }
 0x6b6   :  { %v951_v5 = vsel %vm1630_vm1, %v949_v7, %v927_v10  ;;  %v950_v40 = vsel %vm1659_vm6, %v948_v3, %v926_v48  ;;  %v983_v48 = vsel %vm68_vm13, %v981_v30, %v982_v23 }
 0x6b7   :  { %986 = vrot.lane.b32.xlu0 %v951_v5, %s1326_s4  ;;  %984 = vrot.lane.b32.xlu1 %v950_v40, %s1326_s4  ;;  %v1005_v53 = vmul.f32 %v974_v44, %v951_v5  ;;  %v1021_v57 = vmul.f32 %v977_v55, %v951_v5  ;;  %v1004_v15 = vmul.f32 %v974_v44, %v950_v40 }
 0x6b8   :  { %v955_v60 = vpop.permute.xlu0 %954  ;;  %v953_v61 = vpop.permute.xlu1 %952  ;;  %v1020_v58 = vmul.f32 %v977_v55, %v950_v40 }
 0x6bb   :  { %990 = vrot.lane.b32.xlu0 %v951_v5, %s1327_s5  ;;  %988 = vrot.lane.b32.xlu1 %v950_v40, %s1327_s5  ;;  %v1042_v40 = vsel %vm2236_vm9, %v1040_v63, %v1041_v34 }
 0x6bc   :  { %v959_v45 = vpop.permute.xlu0 %958  ;;  %v957_v52 = vpop.permute.xlu1 %956 }
 0x6bd   :  { %v961_v54 = vsel %vm2236_vm9, %v959_v45, %v955_v60  ;;  %v960_v0 = vsel %vm2236_vm9, %v957_v52, %v953_v61 }
 0x6be   :  { %v963_v19 = vsel %vm1630_vm1, %v961_v54, %v939_v36  ;;  %v962_v33 = vsel %vm1659_vm6, %v960_v0, %v938_v17 }
 0x6bf   :  { %996 = vrot.lane.b32.xlu0 %v963_v19, %s1326_s4  ;;  %v1007_v46 = vmul.f32 %v977_v55, %v963_v19  ;;  %v1019_v56 = vmul.f32 %v974_v44, %v963_v19  ;;  %994 = vrot.lane.b32.xlu1 %v962_v33, %s1326_s4  ;;  %v1006_v8 = vmul.f32 %v977_v55, %v962_v33 }
 0x6c0   :  { %v1018_v18 = vmul.f32 %v974_v44, %v962_v33 }
 0x6c1   :  { %v1009_v62 = vsub.f32 %v1005_v53, %v1007_v46  ;;  %v1008_v9 = vsub.f32 %v1004_v15, %v1006_v8  ;;  %v1023_v12 = vadd.f32 %v1021_v57, %v1019_v56 }
 0x6c2   :  { %v1022_v16 = vadd.f32 %v1020_v58, %v1018_v18  ;;  %v1046_v58 = vstv %s1273_s26  ;;  %v1047_v18 = vstv %s1271_s25 }
 0x6c3   :  { %1000 = vrot.lane.b32.xlu0 %v963_v19, %s1327_s5  ;;  %998 = vrot.lane.b32.xlu1 %v962_v33, %s1327_s5 }
 0x729   :  { %v987_v25 = vpop.permute.xlu0 %986  ;;  %v985_v39 = vpop.permute.xlu1 %984 }
 0x72d   :  { %v991_v51 = vpop.permute.xlu0 %990  ;;  %v989_v20 = vpop.permute.xlu1 %988 }
 0x72e   :  { %v993_v26 = vsel %vm68_vm13, %v991_v51, %v987_v25  ;;  %v992_v32 = vsel %vm68_vm13, %v989_v20, %v985_v39  ;;  %v1048_v25 = vsel %vm2236_vm9, %v1046_v58, %v1047_v18 }
 0x72f   :  { %v1011_v27 = vmul.f32 %v993_v26, %v980_v28  ;;  %v1010_v10 = vmul.f32 %v992_v32, %v980_v28  ;;  %v1029_v3 = vmul.f32 %v993_v26, %v983_v48  ;;  %v1028_v5 = vmul.f32 %v992_v32, %v983_v48 }
 0x730   :  { %v1049_v26 = vstv %s1274_s28  ;;  %v1050_v32 = vstv %s1272_s27 }
 0x731   :  { %v997_v47 = vpop.permute.xlu0 %996  ;;  %v995_v59 = vpop.permute.xlu1 %994  ;;  %v1013_v36 = vadd.f32 %v1011_v27, %v1009_v62  ;;  %v1012_v17 = vadd.f32 %v1010_v10, %v1008_v9  ;;  %v1107_v62 = vld [vmem:[%s2326_s1 + $0x8] sm:$0xff] }
 0x732   :  { %v1109_v24 = vmax.f32 %v1107_v62, 1e-30 }
 0x734   :  { %1297 = vrcp.f32 %v1109_v24 }
 0x735   :  { %v1001_v31 = vpop.permute.xlu0 %1000  ;;  %v999_v35 = vpop.permute.xlu1 %998 }
 0x736   :  { %v1003_v37 = vsel %vm68_vm13, %v1001_v31, %v997_v47  ;;  %v1002_v14 = vsel %vm68_vm13, %v999_v35, %v995_v59  ;;  %v1051_v47 = vsel %vm2236_vm9, %v1049_v26, %v1050_v32 }
 0x737   :  { %v1015_v11 = vmul.f32 %v1003_v37, %v983_v48  ;;  %v1025_v13 = vmul.f32 %v1003_v37, %v980_v28  ;;  %v1014_v49 = vmul.f32 %v1002_v14, %v983_v48  ;;  %v1024_v7 = vmul.f32 %v1002_v14, %v980_v28 }
 0x739   :  { %v1017_v43 = vsub.f32 %v1013_v36, %v1015_v11  ;;  %v1027_v42 = vadd.f32 %v1025_v13, %v1023_v12  ;;  %v1016_v38 = vsub.f32 %v1012_v17, %v1014_v49  ;;  %v1026_v60 = vadd.f32 %v1024_v7, %v1022_v16  ;;  %v1106_v16 = vld [vmem:[%s2326_s1] sm:$0xff] }
 0x73a   :  { %v1108_v51 = vmax.f32 %v1106_v16, 1e-30 }
 0x73b   :  { %v1031_v61 = vadd.f32 %v1029_v3, %v1027_v42  ;;  %v1030_v44 = vadd.f32 %v1028_v5, %v1026_v60  ;;  %1054 = vrot.lane.b32.xlu0 %v1017_v43, %s1328_s0  ;;  %1052 = vrot.lane.b32.xlu1 %v1016_v38, %s1328_s0  ;;  %v1073_v29 = vmul.f32 %v1042_v40, %v1017_v43  ;;  %v1115_v3 = vmul.u32 128, %v1354_v4 }
 0x73c   :  { %v1072_v55 = vmul.f32 %v1042_v40, %v1016_v38  ;;  %v1089_v45 = vmul.f32 %v1045_v50, %v1017_v43  ;;  %v1088_v57 = vmul.f32 %v1045_v50, %v1016_v38  ;;  %1299 = vrcp.f32 %v1108_v51 }
 0x73d   :  { %v1075_v52 = vmul.f32 %v1045_v50, %v1031_v61  ;;  %v1074_v53 = vmul.f32 %v1045_v50, %v1030_v44  ;;  %v1087_v54 = vmul.f32 %v1042_v40, %v1031_v61  ;;  %v1086_v0 = vmul.f32 %v1042_v40, %v1030_v44 }
 0x73e   :  { %v1114_v5 = vmul.u32 128, %v1348_v1  ;;  %v1298_v40 = vpop.eup %1297 }
 0x73f   :  { %1058 = vrot.lane.b32.xlu0 %v1017_v43, %s1329_s12  ;;  %1056 = vrot.lane.b32.xlu1 %v1016_v38, %s1329_s12  ;;  %v1077_v15 = vsub.f32 %v1073_v29, %v1075_v52  ;;  %v1076_v19 = vsub.f32 %v1072_v55, %v1074_v53  ;;  %v1091_v33 = vadd.f32 %v1089_v45, %v1087_v54 }
 0x740   :  { %v1090_v46 = vadd.f32 %v1088_v57, %v1086_v0  ;;  %v1117_v29 = vadd.s32 %v1115_v3, %v1350_v2  ;;  %v1116_v45 = vadd.s32 %v1114_v5, %v1350_v2 }
 0x743   :  { %1064 = vrot.lane.b32.xlu0 %v1031_v61, %s1328_s0  ;;  %1062 = vrot.lane.b32.xlu1 %v1030_v44, %s1328_s0 }
 0x746   :  { %v1300_v38 = vpop.eup %1299 }
 0x747   :  { %1068 = vrot.lane.b32.xlu0 %v1031_v61, %s1329_s12  ;;  %1066 = vrot.lane.b32.xlu1 %v1030_v44, %s1329_s12 }
 0x7ad   :  { %v1055_v56 = vpop.permute.xlu0 %1054  ;;  %v1053_v8 = vpop.permute.xlu1 %1052 }
 0x7b1   :  { %v1059_v9 = vpop.permute.xlu0 %1058  ;;  %v1057_v12 = vpop.permute.xlu1 %1056 }
 0x7b2   :  { %v1061_v39 = vsel %vm2236_vm9, %v1059_v9, %v1055_v56  ;;  %v1060_v22 = vsel %vm2236_vm9, %v1057_v12, %v1053_v8 }
 0x7b3   :  { %v1079_v30 = vmul.f32 %v1061_v39, %v1048_v25  ;;  %v1078_v23 = vmul.f32 %v1060_v22, %v1048_v25  ;;  %v1097_v36 = vmul.f32 %v1061_v39, %v1051_v47  ;;  %v1096_v17 = vmul.f32 %v1060_v22, %v1051_v47 }
 0x7b5   :  { %v1065_v20 = vpop.permute.xlu0 %1064  ;;  %v1063_v28 = vpop.permute.xlu1 %1062  ;;  %v1081_v10 = vadd.f32 %v1079_v30, %v1077_v15  ;;  %v1080_v48 = vadd.f32 %v1078_v23, %v1076_v19 }
 0x7b9   :  { %v1069_v59 = vpop.permute.xlu0 %1068  ;;  %v1067_v27 = vpop.permute.xlu1 %1066 }
 0x7ba   :  { %v1071_v31 = vsel %vm2236_vm9, %v1069_v59, %v1065_v20  ;;  %v1070_v35 = vsel %vm2236_vm9, %v1067_v27, %v1063_v28 }
 0x7bb   :  { %v1083_v63 = vmul.f32 %v1071_v31, %v1051_v47  ;;  %v1093_v34 = vmul.f32 %v1071_v31, %v1048_v25  ;;  %v1082_v41 = vmul.f32 %v1070_v35, %v1051_v47  ;;  %v1092_v21 = vmul.f32 %v1070_v35, %v1048_v25 }
 0x7bc   :  { %v1177_v35 = vsub.s32 10, %v1350_v2 }
 0x7bd   :  { %v1085_v37 = vsub.f32 %v1081_v10, %v1083_v63  ;;  %v1095_v14 = vadd.f32 %v1093_v34, %v1091_v33  ;;  %v1084_v11 = vsub.f32 %v1080_v48, %v1082_v41  ;;  %v1094_v13 = vadd.f32 %v1092_v21, %v1090_v46 }
 0x7be   :  { %vm1178_vm10 = vcmp.gt.s32.totalorder %v1177_v35, 0 }
 0x7bf   :  { %v1099_v49 = vadd.f32 %v1097_v36, %v1095_v14  ;;  %v1098_v7 = vadd.f32 %v1096_v17, %v1094_v13  ;;  %v1101_v50 = vmul.f32 %v1085_v37, %v1085_v37  ;;  %v1100_v43 = vmul.f32 %v1084_v11, %v1084_v11 }
 0x7c1   :  { %v1103_v6 = vmul.f32 %v1099_v49, %v1099_v49  ;;  %v1102_v42 = vmul.f32 %v1098_v7, %v1098_v7  ;;  %v1179_v49 = vsel %vm1178_vm10, %v1177_v35, 0 }
 0x7c3   :  { %v1105_v60 = vadd.f32 %v1103_v6, %v1101_v50  ;;  %v1104_v61 = vadd.f32 %v1102_v42, %v1100_v43 }
 0x7c5   :  { %v1113_v44 = vmul.f32 %v1298_v40, %v1105_v60  ;;  %v1111_v55 = vmul.f32 %v1300_v38, %v1104_v61 }
 0x7c7   :  { %v1121_v52 = vand.u32 4294965248, %v1113_v44  ;;  %v1120_v53 = vand.u32 4294965248, %v1111_v55 }
 0x7c9   :  { %v1123_v54 = vor.u32 %v1121_v52, %v1117_v29  ;;  %v1122_v4 = vor.u32 %v1120_v53, %v1116_v45 }
 0x7cb   :  { %v1139_v0 = vshra.s32 %v1123_v54, 16  ;;  %v1125_v1 = vshra.s32 %v1122_v4, 16  ;;  %v1138_v19 = vand.u32 65535, %v1123_v54  ;;  %v1124_v33 = vand.u32 65535, %v1122_v4 }
 0x7cd   :  { %v1141_v57 = vcvt.s32.f32 %v1139_v0  ;;  %v1127_v15 = vcvt.s32.f32 %v1125_v1  ;;  %v1140_v8 = vcvt.s32.f32 %v1138_v19  ;;  %v1126_v58 = vcvt.s32.f32 %v1124_v33 }
 0x7cf   :  { %1142 = vmax.xlane.f32.xlu0 %v1141_v57  ;;  %1128 = vmax.xlane.f32.xlu1 %v1127_v15 }
 0x85c   :  { %v1143_v46 = vpop.xlane.xlu0 %1142  ;;  %v1129_v56 = vpop.xlane.xlu1 %1128 }
 0x85d   :  { %vm1144_vm11 = vcmp.eq.f32.partialorder %v1141_v57, %v1143_v46  ;;  %vm1130_vm1 = vcmp.eq.f32.partialorder %v1127_v15, %v1129_v56  ;;  %v1149_v9 = vcvt.f32.s32 %v1143_v46  ;;  %v1135_v12 = vcvt.f32.s32 %v1129_v56 }
 0x85e   :  { %v1145_v18 = vsel %vm1144_vm11, %v1140_v8, -inf  ;;  %v1131_v62 = vsel %vm1130_vm1, %v1126_v58, -inf }
 0x85f   :  { %1146 = vmax.xlane.f32.xlu1 %v1145_v18  ;;  %1132 = vmax.xlane.f32.xlu0 %v1131_v62  ;;  %v1150_v39 = vshll.u32 %v1149_v9, 16  ;;  %v1136_v22 = vshll.u32 %v1135_v12, 16 }
 0x8ec   :  { %v1147_v16 = vpop.xlane.xlu1 %1146  ;;  %v1133_v25 = vpop.xlane.xlu0 %1132 }
 0x8ed   :  { %v1148_v24 = vcvt.f32.s32 %v1147_v16  ;;  %v1134_v51 = vcvt.f32.s32 %v1133_v25 }
 0x8ef   :  { %v1151_v20 = vadd.s32 %v1150_v39, %v1148_v24  ;;  %v1137_v28 = vadd.s32 %v1136_v22, %v1134_v51 }
 0x8f1   :  { %vm1152_vm6 = vcmp.gt.s32.totalorder %v1137_v28, %v1151_v20 }
 0x8f2   :  { %v1153_v26 = vsel %vm1152_vm6, %v1137_v28, %v1151_v20 }
 0x8f3   :  { %v1154_v32 = vrot.slane %v1153_v26, 4 }
 0x8f5   :  { %vm1155_vm7 = vcmp.gt.s32.totalorder %v1153_v26, %v1154_v32 }
 0x8f6   :  { %v1156_v30 = vsel %vm1155_vm7, %v1153_v26, %v1154_v32 }
 0x8f7   :  { %v1157_v23 = vrot.slane %v1156_v30, 2 }
 0x8f9   :  { %vm1158_vm4 = vcmp.gt.s32.totalorder %v1156_v30, %v1157_v23 }
 0x8fa   :  { %v1159_v47 = vsel %vm1158_vm4, %v1156_v30, %v1157_v23 }
 0x8fb   :  { %v1160_v59 = vrot.slane %v1159_v47, 1 }
 0x8fd   :  { %vm1161_vm8 = vcmp.gt.s32.totalorder %v1159_v47, %v1160_v59 }
 0x8fe   :  { %v1162_v27 = vsel %vm1161_vm8, %v1159_v47, %v1160_v59 }
 0x8ff   :  { %v1163_v10 = vand.u32 2047, %v1162_v27 }
 0x901   :  { %v1164_v48 = vand.u32 256, %v1163_v10  ;;  %v1166_v31 = vand.u32 1024, %v1163_v10  ;;  %v1171_v41 = vand.u32 512, %v1163_v10  ;;  %v1169_v36 = vand.u32 191, %v1163_v10 }
 0x902   :  { %v1174_v17 = vand.u32 64, %v1163_v10 }
 0x903   :  { %v1165_v63 = vshra.s32 %v1164_v48, 2  ;;  %v1167_v34 = vshra.s32 %v1166_v31, 1  ;;  %v1172_v14 = vshll.u32 %v1171_v41, 1 }
 0x904   :  { %v1175_v13 = vshll.u32 %v1174_v17, 2 }
 0x905   :  { %v1168_v21 = vor.u32 %v1167_v34, %v1165_v63 }
 0x907   :  { %v1170_v37 = vor.u32 %v1169_v36, %v1168_v21 }
 0x909   :  { %v1173_v11 = vor.u32 %v1172_v14, %v1170_v37 }
 0x90b   :  { %v1176_v7 = vor.u32 %v1175_v13, %v1173_v11 }
 0x90d   :  { %v1180_v3 = vshrl.u32 %v1176_v7, %v1179_v49 }
 0x90f   :  { %v1181_v5 = vand.u32 1, %v1180_v3 }
 0x911   :  { %v1183_v40 = vsel %vm1182_vm14, %v1181_v5, 0 }
 0x912   :  { %1184 = vst [vmem:[%s2327_s2] sm:$0x1] %v1183_v40 }
 0x913   :  { %1189 = vsyncpa [#allocation3], 1 }

</bundles_post_ra>
